<compile_context>
chip_gen: v7x
topology: tpu7x:2x2x1
jax: 0.10.0
libtpu: 0.0.40
codegen_flags: <defaults>
</compile_context>

<pallas_src>
import functools

import jax
import jax.numpy as jnp
from jax import lax
from jax.experimental import pallas as pl
from jax.experimental.pallas import tpu as pltpu


# ----------------------------------------------------------------------------
# Fused kernel: one batch element per grid step.
#   x_ref     : (N, C)
#   wqkv_ref  : (C, 3C)   qkv weight, already (in, out)
#   wproj_ref : (C, C)    proj weight, already (in, out)
#   bproj_ref : (1, C)    proj bias
#   bias_ref  : (N, N)    additive mask bias (0 keep / -1e30 masked), f32
#   o_ref     : (N, C)
# ----------------------------------------------------------------------------
def _bpf_attention_kernel(x_ref, wqkv_ref, wproj_ref, bproj_ref, bias_ref, o_ref,
                          *, num_heads, scale):
    N, C = x_ref.shape
    hd = C // num_heads

    x = x_ref[...]

    # qkv = x @ Wqkv  -> (N, 3C), f32 accumulation on the MXU.
    qkv = lax.dot_general(x, wqkv_ref[...], (((1,), (0,)), ((), ())),
                          preferred_element_type=jnp.float32)

    bias = bias_ref[...]

    head_ctx = []
    for h in range(num_heads):                       # unrolled; static lane slices
        q = qkv[:, h * hd:(h + 1) * hd]              # (N, hd)
        k = qkv[:, C + h * hd:C + (h + 1) * hd]      # (N, hd)
        v = qkv[:, 2 * C + h * hd:2 * C + (h + 1) * hd]

        # s = q @ k^T without materializing a transpose (contract last dims).
        s = lax.dot_general(q, k, (((1,), (1,)), ((), ())),
                            preferred_element_type=jnp.float32) * scale
        s = s + bias                                 # masked_fill(mask, -inf) equivalent

        s_max = jnp.max(s, axis=-1, keepdims=True)
        p = jnp.exp(s - s_max)
        denom = jnp.sum(p, axis=-1, keepdims=True)
        p = p * pl.reciprocal(denom, approx=True)    # EUP reciprocal, ~free slot

        head_ctx.append(jnp.dot(p, v, preferred_element_type=jnp.float32))

    ctx = jnp.concatenate(head_ctx, axis=-1)         # (N, C), lane-dense

    out = lax.dot_general(ctx, wproj_ref[...], (((1,), (0,)), ((), ())),
                          preferred_element_type=jnp.float32)
    o_ref[...] = (out + bproj_ref[...]).astype(o_ref.dtype)


# ----------------------------------------------------------------------------
# Wrapper: layout plumbing only (one-time weight transpose + mask -> bias).
# ----------------------------------------------------------------------------
def bpf_attention(x, params, mask, num_heads):
    """x: [B, N, C]; mask: [N, N] (nonzero => masked) or None."""
    B, N, C = x.shape
    assert C % num_heads == 0
    hd = C // num_heads
    scale = hd ** (-0.5)

    # PyTorch Linear weights are (out, in); present them as (in, out) so the
    # kernel feeds the MXU with no in-kernel transpose.
    wqkv_t = params["w_qkv"].T          # (C, 3C)
    wproj_t = params["w_proj"].T        # (C, C)
    bproj = params["b_proj"].reshape(1, C)

    # Precompute the additive mask bias once: 0 where kept, -1e30 where masked.
    if mask is None:
        bias = jnp.zeros((N, N), jnp.float32)
    else:
        bias = jnp.where(mask != 0, jnp.float32(-1e30), jnp.float32(0.0))

    kern = functools.partial(_bpf_attention_kernel, num_heads=num_heads, scale=scale)
    const2d = lambda b: (0, 0)          # grid-invariant blocks stay VMEM-resident

    return pl.pallas_call(
        kern,
        out_shape=jax.ShapeDtypeStruct((B, N, C), x.dtype),
        grid=(B,),
        in_specs=[
            pl.BlockSpec((None, N, C), lambda b: (b, 0, 0)),   # x (per-batch tile)
            pl.BlockSpec((C, 3 * C), const2d),                 # Wqkv^T
            pl.BlockSpec((C, C), const2d),                     # Wproj^T
            pl.BlockSpec((1, C), const2d),                     # proj bias
            pl.BlockSpec((N, N), const2d),                     # mask bias
        ],
        out_specs=pl.BlockSpec((None, N, C), lambda b: (b, 0, 0)),
        compiler_params=pltpu.CompilerParams(
            dimension_semantics=("parallel",)),
    )(x, wqkv_t, wproj_t, bproj, bias)


# ----------------------------------------------------------------------------
# Pure-JAX reference (mirrors the PyTorch forward) for verification
# ----------------------------------------------------------------------------
def bpf_attention_ref(x, params, mask, num_heads):
    B, N, C = x.shape
    H = num_heads
    hd = C // H
    scale = hd ** (-0.5)

    qkv = x @ params["w_qkv"].T                                 # (B, N, 3C)
    qkv = qkv.reshape(B, N, 3, H, hd).transpose(2, 0, 3, 1, 4)
    q, k, v = qkv[0], qkv[1], qkv[2]                            # (B, H, N, hd)
    attn = jnp.einsum("bhnd,bhmd->bhnm", q, k) * scale
    if mask is not None:
        attn = jnp.where((mask != 0)[None, None], -jnp.inf, attn)
    attn = jax.nn.softmax(attn, axis=-1)
    o = jnp.einsum("bhnm,bhmd->bhnd", attn, v)
    o = o.transpose(0, 2, 1, 3).reshape(B, N, C)
    return o @ params["w_proj"].T + params["b_proj"]


if __name__ == "__main__":
    B, N, C, H = 2, 16, 32, 8   # head_dim = 4

    key = jax.random.PRNGKey(0)
    k1, k2, k3, k4 = jax.random.split(key, 4)
    x = jax.random.normal(k1, (B, N, C), jnp.float32)
    params = {
        "w_qkv": jax.random.normal(k2, (3 * C, C), jnp.float32) * 0.05,
        "w_proj": jax.random.normal(k3, (C, C), jnp.float32) * 0.05,
        "b_proj": jax.random.normal(k4, (C,), jnp.float32) * 0.05,
    }
    # boolean mask [N, N] (nonzero => masked); causal so no row is fully masked
    mask = (jnp.arange(N)[None, :] > jnp.arange(N)[:, None]).astype(jnp.int32)

    out = bpf_attention(x, params, mask, H)
    out = jax.block_until_ready(out)

    ref = bpf_attention_ref(x, params, mask, H)
    assert out.shape == (B, N, C)
    # Tolerance loosened slightly vs exact math because the softmax denominator
    # uses the hardware approximate reciprocal (EUP), rel err ~2^-12.
    assert jnp.allclose(out, ref, atol=1e-3, rtol=1e-3), "Pallas output mismatch vs reference"

    print("KERNEL_OK")
</pallas_src>

<mosaic_0001>
module attributes {stable_mosaic.version = 11 : i64} {
  func.func @_bpf_attention_kernel(%arg0: i32, %arg1: memref<1x16x32xf32, #tpu.memory_space<vmem>>, %arg2: memref<32x96xf32, #tpu.memory_space<vmem>>, %arg3: memref<32x32xf32, #tpu.memory_space<vmem>>, %arg4: memref<1x32xf32, #tpu.memory_space<vmem>>, %arg5: memref<16x16xf32, #tpu.memory_space<vmem>>, %arg6: memref<1x16x32xf32, #tpu.memory_space<vmem>>) attributes {dimension_semantics = [#tpu.dimension_semantics<parallel>], iteration_bounds = array<i64: 2>, scalar_prefetch = 0 : i64, scratch_operands = 0 : i64, tpu.core_type = #tpu.core_type<tc>, window_params = [{transform_indices = @transform_0, window_bounds = array<i64: 1, 16, 32>}, {pipeline_mode = #tpu.pipeline_mode<synchronous>, transform_indices = @transform_1, window_bounds = array<i64: 32, 96>}, {pipeline_mode = #tpu.pipeline_mode<synchronous>, transform_indices = @transform_2, window_bounds = array<i64: 32, 32>}, {pipeline_mode = #tpu.pipeline_mode<synchronous>, transform_indices = @transform_3, window_bounds = array<i64: 1, 32>}, {pipeline_mode = #tpu.pipeline_mode<synchronous>, transform_indices = @transform_4, window_bounds = array<i64: 16, 16>}, {transform_indices = @transform_5, window_bounds = array<i64: 1, 16, 32>}]} {
    %c0 = arith.constant 0 : index
    %c0_0 = arith.constant 0 : index
    %c0_1 = arith.constant 0 : index
    %0 = vector.load %arg1[%c0, %c0_0, %c0_1] : memref<1x16x32xf32, #tpu.memory_space<vmem>>, vector<1x16x32xf32>
    %1 = vector.shape_cast %0 : vector<1x16x32xf32> to vector<16x32xf32>
    %c0_2 = arith.constant 0 : index
    %c0_3 = arith.constant 0 : index
    %2 = vector.load %arg2[%c0_2, %c0_3] : memref<32x96xf32, #tpu.memory_space<vmem>>, vector<32x96xf32>
    %cst = arith.constant dense<0.000000e+00> : vector<16x96xf32>
    %3 = tpu.matmul %1, %2, %cst {dimension_numbers = #tpu.dot_dimension_numbers<[1], [0], [0], [1], [0, 0, 1, 1], [], []>} : vector<16x32xf32>, vector<32x96xf32>, vector<16x96xf32> -> vector<16x96xf32>
    %c0_4 = arith.constant 0 : index
    %c0_5 = arith.constant 0 : index
    %4 = vector.load %arg5[%c0_4, %c0_5] : memref<16x16xf32, #tpu.memory_space<vmem>>, vector<16x16xf32>
    %5 = vector.extract_strided_slice %3 {offsets = [0, 0], sizes = [16, 4], strides = [1, 1]} : vector<16x96xf32> to vector<16x4xf32>
    %6 = vector.extract_strided_slice %3 {offsets = [0, 32], sizes = [16, 4], strides = [1, 1]} : vector<16x96xf32> to vector<16x4xf32>
    %7 = vector.extract_strided_slice %3 {offsets = [0, 64], sizes = [16, 4], strides = [1, 1]} : vector<16x96xf32> to vector<16x4xf32>
    %cst_6 = arith.constant dense<0.000000e+00> : vector<16x16xf32>
    %8 = tpu.matmul %5, %6, %cst_6 {dimension_numbers = #tpu.dot_dimension_numbers<[1], [1], [0], [0], [0, 0, 1, 0], [], []>} : vector<16x4xf32>, vector<16x4xf32>, vector<16x16xf32> -> vector<16x16xf32>
    %cst_7 = arith.constant 5.000000e-01 : f32
    %9 = vector.broadcast %cst_7 : f32 to vector<16x16xf32>
    %10 = arith.mulf %8, %9 : vector<16x16xf32>
    %11 = arith.addf %10, %4 : vector<16x16xf32>
    %cst_8 = arith.constant dense<0xFF800000> : vector<16xf32>
    %12 = vector.multi_reduction <maximumf>, %11, %cst_8 [1] : vector<16x16xf32> to vector<16xf32>
    %13 = vector.shape_cast %12 : vector<16xf32> to vector<16x1xf32>
    %14 = vector.broadcast %13 : vector<16x1xf32> to vector<16x16xf32>
    %15 = arith.subf %11, %14 : vector<16x16xf32>
    %16 = math.exp %15 : vector<16x16xf32>
    %cst_9 = arith.constant dense<0.000000e+00> : vector<16xf32>
    %17 = vector.multi_reduction <add>, %16, %cst_9 [1] : vector<16x16xf32> to vector<16xf32>
    %18 = vector.shape_cast %17 : vector<16xf32> to vector<16x1xf32>
    %19 = tpu.reciprocal %18 {approx = true} : vector<16x1xf32> -> vector<16x1xf32>
    %20 = vector.broadcast %19 : vector<16x1xf32> to vector<16x16xf32>
    %21 = arith.mulf %16, %20 : vector<16x16xf32>
    %cst_10 = arith.constant dense<0.000000e+00> : vector<16x4xf32>
    %22 = tpu.matmul %21, %7, %cst_10 {dimension_numbers = #tpu.dot_dimension_numbers<[1], [0], [0], [1], [0, 0, 1, 1], [], []>} : vector<16x16xf32>, vector<16x4xf32>, vector<16x4xf32> -> vector<16x4xf32>
    %23 = vector.extract_strided_slice %3 {offsets = [0, 4], sizes = [16, 4], strides = [1, 1]} : vector<16x96xf32> to vector<16x4xf32>
    %24 = vector.extract_strided_slice %3 {offsets = [0, 36], sizes = [16, 4], strides = [1, 1]} : vector<16x96xf32> to vector<16x4xf32>
    %25 = vector.extract_strided_slice %3 {offsets = [0, 68], sizes = [16, 4], strides = [1, 1]} : vector<16x96xf32> to vector<16x4xf32>
    %cst_11 = arith.constant dense<0.000000e+00> : vector<16x16xf32>
    %26 = tpu.matmul %23, %24, %cst_11 {dimension_numbers = #tpu.dot_dimension_numbers<[1], [1], [0], [0], [0, 0, 1, 0], [], []>} : vector<16x4xf32>, vector<16x4xf32>, vector<16x16xf32> -> vector<16x16xf32>
    %cst_12 = arith.constant 5.000000e-01 : f32
    %27 = vector.broadcast %cst_12 : f32 to vector<16x16xf32>
    %28 = arith.mulf %26, %27 : vector<16x16xf32>
    %29 = arith.addf %28, %4 : vector<16x16xf32>
    %cst_13 = arith.constant dense<0xFF800000> : vector<16xf32>
    %30 = vector.multi_reduction <maximumf>, %29, %cst_13 [1] : vector<16x16xf32> to vector<16xf32>
    %31 = vector.shape_cast %30 : vector<16xf32> to vector<16x1xf32>
    %32 = vector.broadcast %31 : vector<16x1xf32> to vector<16x16xf32>
    %33 = arith.subf %29, %32 : vector<16x16xf32>
    %34 = math.exp %33 : vector<16x16xf32>
    %cst_14 = arith.constant dense<0.000000e+00> : vector<16xf32>
    %35 = vector.multi_reduction <add>, %34, %cst_14 [1] : vector<16x16xf32> to vector<16xf32>
    %36 = vector.shape_cast %35 : vector<16xf32> to vector<16x1xf32>
    %37 = tpu.reciprocal %36 {approx = true} : vector<16x1xf32> -> vector<16x1xf32>
    %38 = vector.broadcast %37 : vector<16x1xf32> to vector<16x16xf32>
    %39 = arith.mulf %34, %38 : vector<16x16xf32>
    %cst_15 = arith.constant dense<0.000000e+00> : vector<16x4xf32>
    %40 = tpu.matmul %39, %25, %cst_15 {dimension_numbers = #tpu.dot_dimension_numbers<[1], [0], [0], [1], [0, 0, 1, 1], [], []>} : vector<16x16xf32>, vector<16x4xf32>, vector<16x4xf32> -> vector<16x4xf32>
    %41 = vector.extract_strided_slice %3 {offsets = [0, 8], sizes = [16, 4], strides = [1, 1]} : vector<16x96xf32> to vector<16x4xf32>
    %42 = vector.extract_strided_slice %3 {offsets = [0, 40], sizes = [16, 4], strides = [1, 1]} : vector<16x96xf32> to vector<16x4xf32>
    %43 = vector.extract_strided_slice %3 {offsets = [0, 72], sizes = [16, 4], strides = [1, 1]} : vector<16x96xf32> to vector<16x4xf32>
    %cst_16 = arith.constant dense<0.000000e+00> : vector<16x16xf32>
    %44 = tpu.matmul %41, %42, %cst_16 {dimension_numbers = #tpu.dot_dimension_numbers<[1], [1], [0], [0], [0, 0, 1, 0], [], []>} : vector<16x4xf32>, vector<16x4xf32>, vector<16x16xf32> -> vector<16x16xf32>
    %cst_17 = arith.constant 5.000000e-01 : f32
    %45 = vector.broadcast %cst_17 : f32 to vector<16x16xf32>
    %46 = arith.mulf %44, %45 : vector<16x16xf32>
    %47 = arith.addf %46, %4 : vector<16x16xf32>
    %cst_18 = arith.constant dense<0xFF800000> : vector<16xf32>
    %48 = vector.multi_reduction <maximumf>, %47, %cst_18 [1] : vector<16x16xf32> to vector<16xf32>
    %49 = vector.shape_cast %48 : vector<16xf32> to vector<16x1xf32>
    %50 = vector.broadcast %49 : vector<16x1xf32> to vector<16x16xf32>
    %51 = arith.subf %47, %50 : vector<16x16xf32>
    %52 = math.exp %51 : vector<16x16xf32>
    %cst_19 = arith.constant dense<0.000000e+00> : vector<16xf32>
    %53 = vector.multi_reduction <add>, %52, %cst_19 [1] : vector<16x16xf32> to vector<16xf32>
    %54 = vector.shape_cast %53 : vector<16xf32> to vector<16x1xf32>
    %55 = tpu.reciprocal %54 {approx = true} : vector<16x1xf32> -> vector<16x1xf32>
    %56 = vector.broadcast %55 : vector<16x1xf32> to vector<16x16xf32>
    %57 = arith.mulf %52, %56 : vector<16x16xf32>
    %cst_20 = arith.constant dense<0.000000e+00> : vector<16x4xf32>
    %58 = tpu.matmul %57, %43, %cst_20 {dimension_numbers = #tpu.dot_dimension_numbers<[1], [0], [0], [1], [0, 0, 1, 1], [], []>} : vector<16x16xf32>, vector<16x4xf32>, vector<16x4xf32> -> vector<16x4xf32>
    %59 = vector.extract_strided_slice %3 {offsets = [0, 12], sizes = [16, 4], strides = [1, 1]} : vector<16x96xf32> to vector<16x4xf32>
    %60 = vector.extract_strided_slice %3 {offsets = [0, 44], sizes = [16, 4], strides = [1, 1]} : vector<16x96xf32> to vector<16x4xf32>
    %61 = vector.extract_strided_slice %3 {offsets = [0, 76], sizes = [16, 4], strides = [1, 1]} : vector<16x96xf32> to vector<16x4xf32>
    %cst_21 = arith.constant dense<0.000000e+00> : vector<16x16xf32>
    %62 = tpu.matmul %59, %60, %cst_21 {dimension_numbers = #tpu.dot_dimension_numbers<[1], [1], [0], [0], [0, 0, 1, 0], [], []>} : vector<16x4xf32>, vector<16x4xf32>, vector<16x16xf32> -> vector<16x16xf32>
    %cst_22 = arith.constant 5.000000e-01 : f32
    %63 = vector.broadcast %cst_22 : f32 to vector<16x16xf32>
    %64 = arith.mulf %62, %63 : vector<16x16xf32>
    %65 = arith.addf %64, %4 : vector<16x16xf32>
    %cst_23 = arith.constant dense<0xFF800000> : vector<16xf32>
    %66 = vector.multi_reduction <maximumf>, %65, %cst_23 [1] : vector<16x16xf32> to vector<16xf32>
    %67 = vector.shape_cast %66 : vector<16xf32> to vector<16x1xf32>
    %68 = vector.broadcast %67 : vector<16x1xf32> to vector<16x16xf32>
    %69 = arith.subf %65, %68 : vector<16x16xf32>
    %70 = math.exp %69 : vector<16x16xf32>
    %cst_24 = arith.constant dense<0.000000e+00> : vector<16xf32>
    %71 = vector.multi_reduction <add>, %70, %cst_24 [1] : vector<16x16xf32> to vector<16xf32>
    %72 = vector.shape_cast %71 : vector<16xf32> to vector<16x1xf32>
    %73 = tpu.reciprocal %72 {approx = true} : vector<16x1xf32> -> vector<16x1xf32>
    %74 = vector.broadcast %73 : vector<16x1xf32> to vector<16x16xf32>
    %75 = arith.mulf %70, %74 : vector<16x16xf32>
    %cst_25 = arith.constant dense<0.000000e+00> : vector<16x4xf32>
    %76 = tpu.matmul %75, %61, %cst_25 {dimension_numbers = #tpu.dot_dimension_numbers<[1], [0], [0], [1], [0, 0, 1, 1], [], []>} : vector<16x16xf32>, vector<16x4xf32>, vector<16x4xf32> -> vector<16x4xf32>
    %77 = vector.extract_strided_slice %3 {offsets = [0, 16], sizes = [16, 4], strides = [1, 1]} : vector<16x96xf32> to vector<16x4xf32>
    %78 = vector.extract_strided_slice %3 {offsets = [0, 48], sizes = [16, 4], strides = [1, 1]} : vector<16x96xf32> to vector<16x4xf32>
    %79 = vector.extract_strided_slice %3 {offsets = [0, 80], sizes = [16, 4], strides = [1, 1]} : vector<16x96xf32> to vector<16x4xf32>
    %cst_26 = arith.constant dense<0.000000e+00> : vector<16x16xf32>
    %80 = tpu.matmul %77, %78, %cst_26 {dimension_numbers = #tpu.dot_dimension_numbers<[1], [1], [0], [0], [0, 0, 1, 0], [], []>} : vector<16x4xf32>, vector<16x4xf32>, vector<16x16xf32> -> vector<16x16xf32>
    %cst_27 = arith.constant 5.000000e-01 : f32
    %81 = vector.broadcast %cst_27 : f32 to vector<16x16xf32>
    %82 = arith.mulf %80, %81 : vector<16x16xf32>
    %83 = arith.addf %82, %4 : vector<16x16xf32>
    %cst_28 = arith.constant dense<0xFF800000> : vector<16xf32>
    %84 = vector.multi_reduction <maximumf>, %83, %cst_28 [1] : vector<16x16xf32> to vector<16xf32>
    %85 = vector.shape_cast %84 : vector<16xf32> to vector<16x1xf32>
    %86 = vector.broadcast %85 : vector<16x1xf32> to vector<16x16xf32>
    %87 = arith.subf %83, %86 : vector<16x16xf32>
    %88 = math.exp %87 : vector<16x16xf32>
    %cst_29 = arith.constant dense<0.000000e+00> : vector<16xf32>
    %89 = vector.multi_reduction <add>, %88, %cst_29 [1] : vector<16x16xf32> to vector<16xf32>
    %90 = vector.shape_cast %89 : vector<16xf32> to vector<16x1xf32>
    %91 = tpu.reciprocal %90 {approx = true} : vector<16x1xf32> -> vector<16x1xf32>
    %92 = vector.broadcast %91 : vector<16x1xf32> to vector<16x16xf32>
    %93 = arith.mulf %88, %92 : vector<16x16xf32>
    %cst_30 = arith.constant dense<0.000000e+00> : vector<16x4xf32>
    %94 = tpu.matmul %93, %79, %cst_30 {dimension_numbers = #tpu.dot_dimension_numbers<[1], [0], [0], [1], [0, 0, 1, 1], [], []>} : vector<16x16xf32>, vector<16x4xf32>, vector<16x4xf32> -> vector<16x4xf32>
    %95 = vector.extract_strided_slice %3 {offsets = [0, 20], sizes = [16, 4], strides = [1, 1]} : vector<16x96xf32> to vector<16x4xf32>
    %96 = vector.extract_strided_slice %3 {offsets = [0, 52], sizes = [16, 4], strides = [1, 1]} : vector<16x96xf32> to vector<16x4xf32>
    %97 = vector.extract_strided_slice %3 {offsets = [0, 84], sizes = [16, 4], strides = [1, 1]} : vector<16x96xf32> to vector<16x4xf32>
    %cst_31 = arith.constant dense<0.000000e+00> : vector<16x16xf32>
    %98 = tpu.matmul %95, %96, %cst_31 {dimension_numbers = #tpu.dot_dimension_numbers<[1], [1], [0], [0], [0, 0, 1, 0], [], []>} : vector<16x4xf32>, vector<16x4xf32>, vector<16x16xf32> -> vector<16x16xf32>
    %cst_32 = arith.constant 5.000000e-01 : f32
    %99 = vector.broadcast %cst_32 : f32 to vector<16x16xf32>
    %100 = arith.mulf %98, %99 : vector<16x16xf32>
    %101 = arith.addf %100, %4 : vector<16x16xf32>
    %cst_33 = arith.constant dense<0xFF800000> : vector<16xf32>
    %102 = vector.multi_reduction <maximumf>, %101, %cst_33 [1] : vector<16x16xf32> to vector<16xf32>
    %103 = vector.shape_cast %102 : vector<16xf32> to vector<16x1xf32>
    %104 = vector.broadcast %103 : vector<16x1xf32> to vector<16x16xf32>
    %105 = arith.subf %101, %104 : vector<16x16xf32>
    %106 = math.exp %105 : vector<16x16xf32>
    %cst_34 = arith.constant dense<0.000000e+00> : vector<16xf32>
    %107 = vector.multi_reduction <add>, %106, %cst_34 [1] : vector<16x16xf32> to vector<16xf32>
    %108 = vector.shape_cast %107 : vector<16xf32> to vector<16x1xf32>
    %109 = tpu.reciprocal %108 {approx = true} : vector<16x1xf32> -> vector<16x1xf32>
    %110 = vector.broadcast %109 : vector<16x1xf32> to vector<16x16xf32>
    %111 = arith.mulf %106, %110 : vector<16x16xf32>
    %cst_35 = arith.constant dense<0.000000e+00> : vector<16x4xf32>
    %112 = tpu.matmul %111, %97, %cst_35 {dimension_numbers = #tpu.dot_dimension_numbers<[1], [0], [0], [1], [0, 0, 1, 1], [], []>} : vector<16x16xf32>, vector<16x4xf32>, vector<16x4xf32> -> vector<16x4xf32>
    %113 = vector.extract_strided_slice %3 {offsets = [0, 24], sizes = [16, 4], strides = [1, 1]} : vector<16x96xf32> to vector<16x4xf32>
    %114 = vector.extract_strided_slice %3 {offsets = [0, 56], sizes = [16, 4], strides = [1, 1]} : vector<16x96xf32> to vector<16x4xf32>
    %115 = vector.extract_strided_slice %3 {offsets = [0, 88], sizes = [16, 4], strides = [1, 1]} : vector<16x96xf32> to vector<16x4xf32>
    %cst_36 = arith.constant dense<0.000000e+00> : vector<16x16xf32>
    %116 = tpu.matmul %113, %114, %cst_36 {dimension_numbers = #tpu.dot_dimension_numbers<[1], [1], [0], [0], [0, 0, 1, 0], [], []>} : vector<16x4xf32>, vector<16x4xf32>, vector<16x16xf32> -> vector<16x16xf32>
    %cst_37 = arith.constant 5.000000e-01 : f32
    %117 = vector.broadcast %cst_37 : f32 to vector<16x16xf32>
    %118 = arith.mulf %116, %117 : vector<16x16xf32>
    %119 = arith.addf %118, %4 : vector<16x16xf32>
    %cst_38 = arith.constant dense<0xFF800000> : vector<16xf32>
    %120 = vector.multi_reduction <maximumf>, %119, %cst_38 [1] : vector<16x16xf32> to vector<16xf32>
    %121 = vector.shape_cast %120 : vector<16xf32> to vector<16x1xf32>
    %122 = vector.broadcast %121 : vector<16x1xf32> to vector<16x16xf32>
    %123 = arith.subf %119, %122 : vector<16x16xf32>
    %124 = math.exp %123 : vector<16x16xf32>
    %cst_39 = arith.constant dense<0.000000e+00> : vector<16xf32>
    %125 = vector.multi_reduction <add>, %124, %cst_39 [1] : vector<16x16xf32> to vector<16xf32>
    %126 = vector.shape_cast %125 : vector<16xf32> to vector<16x1xf32>
    %127 = tpu.reciprocal %126 {approx = true} : vector<16x1xf32> -> vector<16x1xf32>
    %128 = vector.broadcast %127 : vector<16x1xf32> to vector<16x16xf32>
    %129 = arith.mulf %124, %128 : vector<16x16xf32>
    %cst_40 = arith.constant dense<0.000000e+00> : vector<16x4xf32>
    %130 = tpu.matmul %129, %115, %cst_40 {dimension_numbers = #tpu.dot_dimension_numbers<[1], [0], [0], [1], [0, 0, 1, 1], [], []>} : vector<16x16xf32>, vector<16x4xf32>, vector<16x4xf32> -> vector<16x4xf32>
    %131 = vector.extract_strided_slice %3 {offsets = [0, 28], sizes = [16, 4], strides = [1, 1]} : vector<16x96xf32> to vector<16x4xf32>
    %132 = vector.extract_strided_slice %3 {offsets = [0, 60], sizes = [16, 4], strides = [1, 1]} : vector<16x96xf32> to vector<16x4xf32>
    %133 = vector.extract_strided_slice %3 {offsets = [0, 92], sizes = [16, 4], strides = [1, 1]} : vector<16x96xf32> to vector<16x4xf32>
    %cst_41 = arith.constant dense<0.000000e+00> : vector<16x16xf32>
    %134 = tpu.matmul %131, %132, %cst_41 {dimension_numbers = #tpu.dot_dimension_numbers<[1], [1], [0], [0], [0, 0, 1, 0], [], []>} : vector<16x4xf32>, vector<16x4xf32>, vector<16x16xf32> -> vector<16x16xf32>
    %cst_42 = arith.constant 5.000000e-01 : f32
    %135 = vector.broadcast %cst_42 : f32 to vector<16x16xf32>
    %136 = arith.mulf %134, %135 : vector<16x16xf32>
    %137 = arith.addf %136, %4 : vector<16x16xf32>
    %cst_43 = arith.constant dense<0xFF800000> : vector<16xf32>
    %138 = vector.multi_reduction <maximumf>, %137, %cst_43 [1] : vector<16x16xf32> to vector<16xf32>
    %139 = vector.shape_cast %138 : vector<16xf32> to vector<16x1xf32>
    %140 = vector.broadcast %139 : vector<16x1xf32> to vector<16x16xf32>
    %141 = arith.subf %137, %140 : vector<16x16xf32>
    %142 = math.exp %141 : vector<16x16xf32>
    %cst_44 = arith.constant dense<0.000000e+00> : vector<16xf32>
    %143 = vector.multi_reduction <add>, %142, %cst_44 [1] : vector<16x16xf32> to vector<16xf32>
    %144 = vector.shape_cast %143 : vector<16xf32> to vector<16x1xf32>
    %145 = tpu.reciprocal %144 {approx = true} : vector<16x1xf32> -> vector<16x1xf32>
    %146 = vector.broadcast %145 : vector<16x1xf32> to vector<16x16xf32>
    %147 = arith.mulf %142, %146 : vector<16x16xf32>
    %cst_45 = arith.constant dense<0.000000e+00> : vector<16x4xf32>
    %148 = tpu.matmul %147, %133, %cst_45 {dimension_numbers = #tpu.dot_dimension_numbers<[1], [0], [0], [1], [0, 0, 1, 1], [], []>} : vector<16x16xf32>, vector<16x4xf32>, vector<16x4xf32> -> vector<16x4xf32>
    %149 = tpu.concatenate %22, %40, %58, %76, %94, %112, %130, %148 in 1 : vector<16x4xf32>, vector<16x4xf32>, vector<16x4xf32>, vector<16x4xf32>, vector<16x4xf32>, vector<16x4xf32>, vector<16x4xf32>, vector<16x4xf32> -> vector<16x32xf32>
    %c0_46 = arith.constant 0 : index
    %c0_47 = arith.constant 0 : index
    %150 = vector.load %arg3[%c0_46, %c0_47] : memref<32x32xf32, #tpu.memory_space<vmem>>, vector<32x32xf32>
    %cst_48 = arith.constant dense<0.000000e+00> : vector<16x32xf32>
    %151 = tpu.matmul %149, %150, %cst_48 {dimension_numbers = #tpu.dot_dimension_numbers<[1], [0], [0], [1], [0, 0, 1, 1], [], []>} : vector<16x32xf32>, vector<32x32xf32>, vector<16x32xf32> -> vector<16x32xf32>
    %c0_49 = arith.constant 0 : index
    %c0_50 = arith.constant 0 : index
    %152 = vector.load %arg4[%c0_49, %c0_50] : memref<1x32xf32, #tpu.memory_space<vmem>>, vector<1x32xf32>
    %153 = vector.broadcast %152 : vector<1x32xf32> to vector<16x32xf32>
    %154 = arith.addf %151, %153 : vector<16x32xf32>
    %c0_51 = arith.constant 0 : index
    %c0_52 = arith.constant 0 : index
    %c0_53 = arith.constant 0 : index
    %155 = vector.load %arg6[%c0_51, %c0_52, %c0_53] : memref<1x16x32xf32, #tpu.memory_space<vmem>>, vector<1x16x32xf32>
    %156 = vector.shape_cast %155 : vector<1x16x32xf32> to vector<16x32xf32>
    %157 = vector.shape_cast %154 : vector<16x32xf32> to vector<1x16x32xf32>
    tpu.vector_store %arg6[%c0_51, %c0_52, %c0_53], %157 {strides = array<i32>} : memref<1x16x32xf32, #tpu.memory_space<vmem>>, vector<1x16x32xf32>,
    return
  }
  func.func @transform_0(%arg0: i32) -> (i32, i32, i32) {
    %c0_i32 = arith.constant 0 : i32
    %c0_i32_0 = arith.constant 0 : i32
    %c0_i32_1 = arith.constant 0 : i32
    return %arg0, %c0_i32, %c0_i32_0 : i32, i32, i32
  }
  func.func @transform_1(%arg0: i32) -> (i32, i32) {
    %c0_i32 = arith.constant 0 : i32
    %c0_i32_0 = arith.constant 0 : i32
    %c0_i32_1 = arith.constant 0 : i32
    return %c0_i32, %c0_i32_0 : i32, i32
  }
  func.func @transform_2(%arg0: i32) -> (i32, i32) {
    %c0_i32 = arith.constant 0 : i32
    %c0_i32_0 = arith.constant 0 : i32
    %c0_i32_1 = arith.constant 0 : i32
    return %c0_i32, %c0_i32_0 : i32, i32
  }
  func.func @transform_3(%arg0: i32) -> (i32, i32) {
    %c0_i32 = arith.constant 0 : i32
    %c0_i32_0 = arith.constant 0 : i32
    %c0_i32_1 = arith.constant 0 : i32
    return %c0_i32, %c0_i32_0 : i32, i32
  }
  func.func @transform_4(%arg0: i32) -> (i32, i32) {
    %c0_i32 = arith.constant 0 : i32
    %c0_i32_0 = arith.constant 0 : i32
    %c0_i32_1 = arith.constant 0 : i32
    return %c0_i32, %c0_i32_0 : i32, i32
  }
  func.func @transform_5(%arg0: i32) -> (i32, i32, i32) {
    %c0_i32 = arith.constant 0 : i32
    %c0_i32_0 = arith.constant 0 : i32
    %c0_i32_1 = arith.constant 0 : i32
    return %arg0, %c0_i32, %c0_i32_0 : i32, i32, i32
  }
}

</mosaic_0001>

<bundles_post_ra>
// kernel: tpu_custom_call.1
= control target key start
LH: loop header
LB: loop body
LE: loop exit
PB: predicated region body
PF: predicated region fallthrough
CT: control target
= control target key end

     0   :  { %10 = vsyncpa [#allocation3], 0  ;;  %s3676_s0 = inlined_call_operand.hbm [shape: f32[2,16,32], index: 0, kind: input, shape index: {}]   ;;  %s3677_s1 = inlined_call_operand.hbm [shape: f32[32,96], index: 1, kind: input, shape index: {}]   ;;  %s3678_s2 = inlined_call_operand.hbm [shape: f32[32,32], index: 2, kind: input, shape index: {}]   ;;  %s3679_s3 = inlined_call_operand.vmem [shape: f32[1,32], index: 3, kind: input, shape index: {}]   ;;  %s3680_s4 = inlined_call_operand.hbm [shape: f32[16,16], index: 4, kind: input, shape index: {}]   ;;  %s3681_s5 = inlined_call_operand.hbm [shape: f32[2,16,32], index: 5, kind: output, shape index: {}]  }
   0x1   :  { %12 = vsyncpa [#allocation3 + $0x1], 0 }
   0x2   :  { %13 = vsyncpa [#allocation6], 0 }
   0x3   :  { %14 = vsyncpa [#allocation9], 0 }
   0x4   :  { %15 = vsyncpa [#allocation4], 0 }
   0x5   :  { %17 = vsyncpa [#allocation4 + $0x1], 0  ;;  %s3187_s18 = smov 0   ;;  %s3189_s19 = smov 0  }
   0x6   :  { %s3191_s20 = smov 0   ;;  %s3193_s21 = smov 0  }
   0x7 LB: > { %s3208_s22 = sadd.s32 4294967295, %s3117_s21   ;;  %s2294_s23 = sadd.s32 4294967294, %s3117_s21   ;;  %s3117_s21 = sphi %s3193_s21, %s3706_s21   ;;  %s3113_s20 = sphi %s3191_s20, %s3705_s20   ;;  %s3109_s19 = sphi %s3189_s19, %s3704_s19   ;;  %s3105_s18 = sphi %s3187_s18, %s3703_s18  }
   0x8   : > { %p43_p0 = scmp.ne.s32.totalorder %s3109_s19, %s3105_s18  ;;  %p3682_p1 = scmp.eq.s32.totalorder %s3208_s22, 0 }
   0x9   : > { %p157_p3 = scmp.eq.s32.totalorder %s2294_s23, 1  ;;  %p2295_p5 = scmp.ge.s32.totalorder %s3117_s21, 1 }
   0xa   : > { %p3217_p4 = por %p3682_p1, %p43_p0  ;;  %p164_p7 = scmp.lt.s32.totalorder %s3117_s21, 3 }
   0xb   : > { %p3222_p6 = por %p157_p3, %p43_p0  ;;  %s3119_s27 = smov [#allocation5]  }
   0xc   : > { %s3685_s24 = scalar_select %p3217_p4, 1, 0 }
   0xd   : > { %s3686_s25 = scalar_select %p3222_p6, 1, 0 }
   0xe   : > { %p3227_p8 = pnand %p2295_p5, %p164_p7  ;;  %s176_s28 = sshll.u32 %s3119_s27, 4  ;;  %s3231_s28 = int_to_ptr.vmem [resolvable:$true] %s176_s28 }
   0xf   : > { %s3120_s30 = smov [#allocation7]   ;;  %s3121_s7 = smov [#allocation8]  }
  0x10   : > { %s3687_s26 = scalar_select %p3227_p8, 1, 0 }
  0x11   : > { %p2691_p9 = pneg %p3227_p8  ;;  %s189_s6 = sshll.u32 %s3120_s30, 4  ;;  %s3242_s6 = int_to_ptr.vmem [resolvable:$true] %s189_s6 }
  0x12   : > { %s3244_s8 = sshll.u32 %s3121_s7, 4  ;;  %s2929_s11 = scalar_lea.hbm %s3677_s1, 512  ;;  %s206_s8 = int_to_ptr.vmem [resolvable:$true] %s3244_s8 }
  0x13   : > { %p3238_p11 = pnand %p2691_p9, %p3682_p1  ;;  %p2930_p12 = scmp.ne.s32.totalorder %s3677_s1, %s2929_s11 }
  0x14   : > { %p2936_p5 = scmp.lt.u32.totalorder %s2929_s11, %s3677_s1 }
  0x15   : > { %p3254_p13 = pneg %p3238_p11 }
  0x17   : > { %p2932_p0 = pnand %p3254_p13, %p2930_p12 }
  0x19   : > { %p2933_p3 = pneg %p2932_p0 }
  0x1b   : > { %p2938_p7 = pnand %p2936_p5, %p2933_p3 }
  0x1d   : > { %2941 = shalt.err (!%p2938_p7)
}
  0x1e   : > { %s2942_s17 = scalar_lea.vmem %s3231_s28, 512  ;;  %p2950_p2 = scmp.lt.s32.totalorder %s3231_s28, %s3231_s28 }
  0x1f   : > { %p2943_p9 = scmp.ne.s32.totalorder %s3231_s28, %s2942_s17  ;;  %p2951_p6 = scmp.lt.s32.totalorder %s2942_s17, %s2942_s17 }
  0x21   : > { %p2945_p10 = pnand %p2943_p9, %p3254_p13  ;;  %p2952_p12 = por %p2951_p6, %p2950_p2 }
  0x23   : > { %p2946_p1 = pneg %p2945_p10 }
  0x25   : > { %p2953_p0 = pnand %p2952_p12, %p2946_p1 }
  0x27   : > { %2956 = shalt.err (!%p2953_p0)
}
  0x28   : > { %s3122_s23 = smov 128   ;;  %s3123_s27 = smov 8  }
  0x29   : > { %2694 = dma.hbm_to_vmem [thread:$0]  (!%p3238_p11), %s3677_s1, 512, %s3231_s28, [#allocation6], %s3122_s23, %s3122_s23, %s3123_s27  }
  0x2a   : > { %s2957_s11 = scalar_lea.hbm %s3678_s2, 512 }
  0x2b   : > { %p2958_p1 = scmp.ne.s32.totalorder %s3678_s2, %s2957_s11  ;;  %p2964_p10 = scmp.lt.u32.totalorder %s2957_s11, %s3678_s2 }
  0x2d   : > { %p2960_p2 = pnand %p2958_p1, %p3254_p13 }
  0x2f   : > { %p2961_p6 = pneg %p2960_p2 }
  0x31   : > { %p2966_p3 = pnand %p2964_p10, %p2961_p6 }
  0x33   : > { %2969 = shalt.err (!%p2966_p3)
}
  0x34   : > { %s2970_s28 = scalar_lea.vmem %s3242_s6, 512  ;;  %p2978_p12 = scmp.lt.s32.totalorder %s3242_s6, %s3242_s6 }
  0x35   : > { %p2971_p5 = scmp.ne.s32.totalorder %s3242_s6, %s2970_s28  ;;  %p2979_p0 = scmp.lt.s32.totalorder %s2970_s28, %s2970_s28 }
  0x37   : > { %p2973_p7 = pnand %p2971_p5, %p3254_p13  ;;  %p2980_p1 = por %p2979_p0, %p2978_p12 }
  0x39   : > { %p2974_p9 = pneg %p2973_p7 }
  0x3b   : > { %p2981_p2 = pnand %p2980_p1, %p2974_p9 }
  0x3d   : > { %2984 = shalt.err (!%p2981_p2)
}
  0x3e   : > { %2697 = dma.hbm_to_vmem [thread:$0]  (!%p3238_p11), %s3678_s2, 512, %s3242_s6, [#allocation6], %s3122_s23, %s3122_s23, %s3123_s27  }
  0x3f   : > { %s2985_s10 = scalar_lea.hbm %s3680_s4, 256 }
  0x40   : > { %p2986_p6 = scmp.ne.s32.totalorder %s3680_s4, %s2985_s10  ;;  %p2992_p5 = scmp.lt.u32.totalorder %s2985_s10, %s3680_s4 }
  0x42   : > { %p2988_p10 = pnand %p2986_p6, %p3254_p13 }
  0x44   : > { %p2989_p3 = pneg %p2988_p10 }
  0x46   : > { %p2994_p7 = pnand %p2992_p5, %p2989_p3 }
  0x48   : > { %2997 = shalt.err (!%p2994_p7)
}
  0x49   : > { %s2998_s16 = scalar_lea.vmem %s206_s8, 256  ;;  %p3006_p1 = scmp.lt.s32.totalorder %s206_s8, %s206_s8 }
  0x4a   : > { %p2999_p9 = scmp.ne.s32.totalorder %s206_s8, %s2998_s16  ;;  %p3007_p2 = scmp.lt.s32.totalorder %s2998_s16, %s2998_s16 }
  0x4c   : > { %p3001_p12 = pnand %p2999_p9, %p3254_p13  ;;  %p3008_p4 = por %p3007_p2, %p3006_p1 }
  0x4e   : > { %p3002_p0 = pneg %p3001_p12 }
  0x50   : > { %p3009_p8 = pnand %p3008_p4, %p3002_p0 }
  0x52   : > { %3012 = shalt.err (!%p3009_p8)
}
  0x53   : > { %2700 = dma.hbm_to_vmem [thread:$0]  (!%p3238_p11), %s3680_s4, 256, %s206_s8, [#allocation9], %s3122_s23, %s3122_s23, %s3123_s27  }
  0x54   : > { %s3327_s14 = sadd.s32 1, %s3117_s21   ;;  %s30_s17 = sadd.s32 1, %s3113_s20 }
  0x55   : > { %s27_s29 = ssub.s32 %s3117_s21, %s3327_s14  ;;  %p37_p8 = scmp.ne.s32.totalorder %s3113_s20, %s3109_s19 }
  0x56   : > { %p28_p4 = scmp.eq.s32.totalorder %s27_s29, 0  ;;  %p38_p13 = scmp.eq.s32.totalorder %s3117_s21, 0 }
  0x57   : > { %p2712_p6 = scmp.lt.s32.totalorder %s3117_s21, 2  ;;  %p3690_p3 = scmp.eq.s32.totalorder %s3208_s22, 1 }
  0x58   : > { %s3337_s30 = scalar_select %p28_p4, %s3113_s20, %s30_s17  }
  0x59   : > { %p39_p10 = por %p38_p13, %p37_p8  ;;  %p3341_p5 = por %p3690_p3, %p37_p8 }
  0x5a   : > { %s219_s9 = sand.u32 1, %s3113_s20   ;;  %s2367_s10 = sshll.u32 %s3117_s21, 8 }
  0x5b   : > { %s2300_s8 = sshll.u32 %s219_s9, 4  ;;  %s3350_s13 = scalar_lea.hbm %s3676_s0, %s2367_s10 }
  0x5c   : > { %s223_s15 = scalar_lea.vmem [#allocation2], %s2300_s8  ;;  %p3352_p11 = pnand %p2712_p6, %p39_p10 }
  0x5d   : > { %s230_s16 = sshll.u32 %s223_s15, 4  ;;  %s3358_s28 = scalar_lea.sflag [#allocation3], %s219_s9  ;;  %s3356_s16 = int_to_ptr.vmem [resolvable:$true] %s230_s16 }
  0x5e   : > { %s3013_s29 = scalar_lea.hbm %s3350_s13, 256  ;;  %p3015_p9 = pneg %p3352_p11 }
  0x5f   : > { %p3014_p7 = scmp.ne.s32.totalorder %s3350_s13, %s3013_s29  ;;  %s3018_s8 = scalar_lea.hbm %s3676_s0, 512 }
  0x60   : > { %p3019_p1 = scmp.lt.u32.totalorder %s3350_s13, %s3676_s0  ;;  %p3020_p2 = scmp.lt.u32.totalorder %s3018_s8, %s3013_s29 }
  0x61   : > { %p3016_p12 = pnand %p3015_p9, %p3014_p7  ;;  %p3022_p8 = scmp.lt.u32.totalorder %s3013_s29, %s3350_s13 }
  0x62   : > { %p3021_p4 = por %p3020_p2, %p3019_p1 }
  0x63   : > { %p3017_p0 = pneg %p3016_p12 }
  0x64   : > { %p3023_p13 = por %p3022_p8, %p3021_p4 }
  0x66   : > { %p3024_p6 = pnand %p3023_p13, %p3017_p0 }
  0x68   : > { %3027 = shalt.err (!%p3024_p6)
}
  0x69   : > { %s3028_s9 = scalar_lea.vmem %s3356_s16, 256  ;;  %s3124_s15 = smov [#allocation2]  }
  0x6a   : > { %p3029_p10 = scmp.ne.s32.totalorder %s3356_s16, %s3028_s9  ;;  %s3033_s17 = sshll.u32 %s3124_s15, 4  ;;  %s3034_s17 = int_to_ptr.vmem [resolvable:$false] %s3033_s17 }
  0x6b   : > { %s3035_s10 = scalar_lea.vmem %s3034_s17, 512  ;;  %p3036_p12 = scmp.lt.s32.totalorder %s3356_s16, %s3034_s17 }
  0x6c   : > { %p3031_p3 = pnand %p3029_p10, %p3015_p9  ;;  %p3037_p1 = scmp.lt.s32.totalorder %s3035_s10, %s3028_s9 }
  0x6e   : > { %p3032_p7 = pneg %p3031_p3  ;;  %p3038_p2 = por %p3037_p1, %p3036_p12 }
  0x70   : > { %p3039_p4 = pnand %p3038_p2, %p3032_p7 }
  0x72   : > { %3042 = shalt.err (!%p3039_p4)
}
  0x73   : > { %2704 = dma.hbm_to_vmem [thread:$0]  (!%p3352_p11), %s3350_s13, 256, %s3356_s16, %s3358_s28, %s3122_s23, %s3122_s23, %s3123_s27  }
  0x74   : > { %p3693_p9 = scmp.ne.s32.totalorder %s3687_s26, 0 }
  0x75   : > { %s3392_s29 = sand.u32 (!%p3693_p9), 1, %s3109_s19   ;;  %p3694_p0 = scmp.ne.s32.totalorder (!%p3693_p9), %s3685_s24, 0 }
  0x76   : > { %242 = sbr.rel (%p3693_p9) target bundleno = 5379 (0x1503), region = 40  ;;  %s2304_s8 = sshll.u32 (!%p3693_p9), %s3392_s29, 4 }
  0x77   : > { %s245_s11 = scalar_lea.sflag (!%p3693_p9), [#allocation3], %s3392_s29  ;;  %s248_s6 = scalar_lea.vmem (!%p3693_p9), [#allocation2], %s2304_s8 }
  0x7d   : > { %3088 = dma.done.wait (%p3694_p0), %s245_s11, 256  }
  0x7e   : > { %3090 = vsyncadd (%p3694_p0), %s245_s11, 4294967040  ;;  %p3695_p11 = scmp.eq.s32.totalorder %s3208_s22, 0 }
  0x80   : > { %3092 = dma.done.wait (%p3695_p11), [#allocation6], 1024   ;;  %p3696_p8 = pmov %p3695_p11 }
  0x82   : > { %3094 = vsyncadd (%p3696_p8), [#allocation6], 4294966272  ;;  %p3697_p13 = pmov %p3696_p8 }
  0x83   : > { %p3698_p6 = pmov %p3696_p8 }
  0x84   : > { %3096 = dma.done.wait (%p3697_p13), [#allocation9], 256  }
  0x85   : > { %3098 = vsyncadd (%p3698_p6), [#allocation9], 4294967040  ;;  %vm293_vm0 = vcmask 261120   ;;  %v289_v0 = vld [vmem:[#allocation5] sm:$0xff]  ;;  %v290_v1 = vld [vmem:[#allocation5 + $0x8] sm:$0xff]  ;;  %vm383_vm1 = vcmask 31744  }
  0x86   : > { %v291_v2 = vld [vmem:[#allocation5 + $0x10] sm:$0xff]  ;;  %v2579_v3 = vpack.c.bf16 %v290_v1, %v289_v0  ;;  %v292_v4 = vld [vmem:[#allocation5 + $0x18] sm:$0xff]  ;;  %s3125_s24 = smov 96   ;;  %vm3425_vm2 = vmpackc.low %vm383_vm1, %vm383_vm1  ;;  %vm471_vm3 = vcmask 130048   ;;  %s3126_s26 = smov 64   ;;  %vm2067_vm4 = vcmask 64512  }
  0x87   : > { %v287_v5 = vld [vmem:[%s248_s6] sm:$0xff]  ;;  %v2583_v6 = vpack.c.bf16 %v292_v4, %v291_v2  ;;  %v288_v7 = vld [vmem:[%s248_s6 + $0x8] sm:$0xff]  ;;  %s3127_s23 = smov 92   ;;  %s3128_s27 = smov 124   ;;  %vm2070_vm5 = vcmask 97280   ;;  %vm2075_vm6 = vcmask 162816  }
  0x88   : > { %2453 = vmatprep.mubr.msk.f32.mxu0 %vm293_vm0, %v287_v5  ;;  %2580 = vmatprep.subr.bf16.mxu0 %v2579_v3  ;;  %v3435_v17 = vld [vmem:[#allocation8 + $0x8] sm:$0xff]  ;;  %v3437_v20 = vld [vmem:[#allocation8] sm:$0xff]  ;;  %s3129_s13 = smov 60   ;;  %s3130_s16 = smov 88   ;;  %vm2078_vm7 = vcmask 195584   ;;  %vm2081_vm8 = vcmask 228352  }
  0x89   : > { %2582 = vmatpush3.bf16.msra.mxu0 %v2579_v3  ;;  %s3131_s28 = smov 120   ;;  %s3132_s12 = smov 84  }
  0x8a   : > { %2584 = vmatprep.subr.bf16.mxu0 %v2583_v6  ;;  %s3133_s9 = smov 116   ;;  %s3134_s15 = smov 56  }
  0x8b   : > { %s3135_s17 = smov 80   ;;  %s3136_s10 = smov 112  }
  0x8c   : > { %s3137_s11 = smov 52   ;;  %s3138_s6 = smov 76  }
  0x8d   : > { %2586 = vmatpush3.bf16.msra.mxu0 %v2583_v6 }
  0x90   : > { %2454 = vmatmul.mubr.msk.f32.vlgmr.msra.gmra.mrb[0].mxu0 %vm293_vm0, %v288_v7 }
 0x163   : > { %v3412_v8 = vpop.f32.mrb[0].mxu0 }
 0x164   : > { %v3414_v9 = vpop.f32.mrb[1].mxu0 }
 0x165   : > { %2460 = vmatprep.mubr.msk.f32.mxu1 %vm383_vm1, %v3414_v9  ;;  %v3420_v10 = vpack.i.bf16 %v3412_v8, %v3414_v9 }
 0x167   : > { %2786 = vrot.lane.b32.xlu0 %v3420_v10, %s3125_s24  ;;  %s3139_s24 = smov 108  }
 0x1d9   : > { %v2787_v11 = vpop.permute.xlu0 %2786 }
 0x1da   : > { %v2789_v12 = vunpack.i.h.bf16 %v2787_v11  ;;  %v2788_v13 = vunpack.i.l.bf16 %v2787_v11 }
 0x1dc   : > { %v2587_v15 = vpack.c.bf16 %v2789_v12, %v2788_v13 }
 0x1de   : > { %2589 = vmatprep.subr.msk.bf16.mxu1 %vm3425_vm2, %v2587_v15 }
 0x1df   : > { %2592 = vmatpush3.bf16.xpose.msk.msra.mxu1 %vm3425_vm2, %v2587_v15 }
 0x1e6   : > { %2461 = vmatmul.mubr.msk.f32.vlgmr.msra.gmra.mrb[0].mxu1 %vm383_vm1, %v3412_v8 }
 0x2b9   : > { %v2462_v16 = vpop.f32.mrb[0].mxu1 }
 0x2ba   : > { %v468_v18 = vmul.f32 0.5, %v2462_v16  ;;  %v458_v19 = vpop.f32.mrb[1].mxu1 }
 0x2bb   : > { %v467_v21 = vmul.f32 0.5, %v458_v19 }
 0x2bc   : > { %v470_v22 = vadd.f32 %v468_v18, %v3435_v17 }
 0x2bd   : > { %v469_v23 = vadd.f32 %v467_v21, %v3437_v20 }
 0x2be   : > { %v475_v24 = vsel %vm471_vm3, %v470_v22, -inf }
 0x2bf   : > { %476 = vmax.xlane.f32.xlu1 %v475_v24  ;;  %v472_v25 = vsel %vm471_vm3, %v469_v23, -inf }
 0x2c0   : > { %473 = vmax.xlane.f32.xlu0 %v472_v25 }
 0x2d0   : > { %2791 = vrot.lane.b32.xlu1 %v3420_v10, %s3126_s26  ;;  %s3140_s26 = smov 48  }
 0x2d4   : > { %2796 = vrot.lane.b32.xlu1 %v3420_v10, %s3127_s23  ;;  %s3141_s23 = smov 72  }
 0x2d6   : > { %583 = vrot.lane.b32.xlu0 %v3412_v8, %s3128_s27 }
 0x34c   : > { %v477_v26 = vpop.xlane.xlu1 %476 }
 0x34d   : > { %v479_v27 = vsub.f32 %v470_v22, %v477_v26  ;;  %v474_v28 = vpop.xlane.xlu0 %473 }
 0x34e   : > { %v478_v29 = vsub.f32 %v469_v23, %v474_v28 }
 0x34f   : > { %v482_v30 = vmul.f32 1.442695, %v479_v27 }
 0x350   : > { %v480_v31 = vmul.f32 1.442695, %v478_v29  ;;  %v2792_v32 = vpop.permute.xlu1 %2791 }
 0x351   : > { %2865 = vpow2.f32 %v482_v30  ;;  %v2794_v33 = vunpack.i.h.bf16 %v2792_v32  ;;  %v2793_v34 = vunpack.i.l.bf16 %v2792_v32  ;;  %v584_v51 = vpop.permute.xlu0 %583 }
 0x352   : > { %2867 = vpow2.f32 %v480_v31 }
 0x353   : > { %v2593_v35 = vpack.c.bf16 %v2794_v33, %v2793_v34 }
 0x354   : > { %v2797_v36 = vpop.permute.xlu1 %2796 }
 0x355   : > { %v2799_v37 = vunpack.i.h.bf16 %v2797_v36  ;;  %v2798_v38 = vunpack.i.l.bf16 %v2797_v36  ;;  %2594 = vmatprep.subr.bf16.mxu1 %v2593_v35 }
 0x356   : > { %2596 = vmatpush3.bf16.msra.mxu1 %v2593_v35 }
 0x357   : > { %v2597_v39 = vpack.c.bf16 %v2799_v37, %v2798_v38 }
 0x359   : > { %2599 = vmatprep.subr.msk.bf16.mxu1 %vm3425_vm2, %v2597_v39 }
 0x35b   : > { %v2866_v40 = vpop.eup %2865 }
 0x35c   : > { %v487_v41 = vsel %vm471_vm3, %v2866_v40, 0.0  ;;  %v2868_v42 = vpop.eup %2867 }
 0x35d   : > { %488 = vadd.xlane.f32.xlu1 %v487_v41  ;;  %v484_v43 = vsel %vm471_vm3, %v2868_v42, 0.0 }
 0x361   : > { %485 = vadd.xlane.f32.xlu1 %v484_v43 }
 0x372   : > { %581 = vrot.lane.b32.xlu1 %v3414_v9, %s3128_s27  ;;  %s3142_s27 = smov 104  }
 0x3ea   : > { %v489_v44 = vpop.xlane.xlu1 %488 }
 0x3eb   : > { %2869 = vrcp.f32 %v489_v44 }
 0x3ee   : > { %v486_v45 = vpop.xlane.xlu1 %485 }
 0x3ef   : > { %2871 = vrcp.f32 %v486_v45 }
 0x3f2   : > { %v582_v50 = vpop.permute.xlu1 %581 }
 0x3f5   : > { %v2870_v46 = vpop.eup %2869 }
 0x3f6   : > { %v493_v49 = vmul.f32 %v2870_v46, %v2866_v40 }
 0x3f9   : > { %v2872_v47 = vpop.eup %2871 }
 0x3fa   : > { %v492_v48 = vmul.f32 %v2872_v47, %v2868_v42 }
 0x3fc   : > { %2467 = vmatprep.mubr.msk.f32.mxu1 %vm471_vm3, %v492_v48 }
 0x3fd   : > { %2468 = vmatmul.mubr.msk.f32.vlgmr.msra.gmra.mrb[2].mxu1 %vm471_vm3, %v493_v49 }
 0x3fe   : > { %2602 = vmatpush3.bf16.xpose.msk.msra.mxu1 %vm3425_vm2, %v2597_v39  ;;  %2474 = vmatprep.mubr.msk.f32.mxu1 %vm383_vm1, %v582_v50 }
 0x405   : > { %2475 = vmatmul.mubr.msk.f32.vlgmr.msra.gmra.mrb[4].mxu1 %vm383_vm1, %v584_v51 }
 0x4d0   : > { %v3457_v52 = vpop.f32.mrb[2].mxu1 }
 0x4d1   : > { %v3459_v53 = vpop.f32.mrb[3].mxu1 }
 0x4d8   : > { %v2476_v54 = vpop.f32.mrb[4].mxu1 }
 0x4d9   : > { %v673_v55 = vmul.f32 0.5, %v2476_v54  ;;  %v663_v56 = vpop.f32.mrb[5].mxu1 }
 0x4da   : > { %v672_v57 = vmul.f32 0.5, %v663_v56 }
 0x4db   : > { %v675_v58 = vadd.f32 %v673_v55, %v3435_v17 }
 0x4dc   : > { %v674_v59 = vadd.f32 %v672_v57, %v3437_v20 }
 0x4dd   : > { %v679_v60 = vsel %vm471_vm3, %v675_v58, -inf }
 0x4de   : > { %680 = vmax.xlane.f32.xlu0 %v679_v60  ;;  %v676_v61 = vsel %vm471_vm3, %v674_v59, -inf }
 0x4df   : > { %677 = vmax.xlane.f32.xlu1 %v676_v61 }
 0x4f0   : > { %2801 = vrot.lane.b32.xlu1 %v3420_v10, %s3129_s13  ;;  %s3143_s13 = smov 44  }
 0x4f4   : > { %2806 = vrot.lane.b32.xlu0 %v3420_v10, %s3130_s16  ;;  %785 = vrot.lane.b32.xlu1 %v3414_v9, %s3131_s28  ;;  %s3144_s16 = smov 68  }
 0x56b   : > { %v681_v62 = vpop.xlane.xlu0 %680 }
 0x56c   : > { %v683_v63 = vsub.f32 %v675_v58, %v681_v62  ;;  %v678_v0 = vpop.xlane.xlu1 %677 }
 0x56d   : > { %v682_v1 = vsub.f32 %v674_v59, %v678_v0 }
 0x56e   : > { %v686_v2 = vmul.f32 1.442695, %v683_v63 }
 0x56f   : > { %v684_v3 = vmul.f32 1.442695, %v682_v1  ;;  %v2807_v4 = vpop.permute.xlu0 %2806 }
 0x570   : > { %2873 = vpow2.f32 %v686_v2  ;;  %v2802_v5 = vpop.permute.xlu1 %2801  ;;  %v2809_v6 = vunpack.i.h.bf16 %v2807_v4  ;;  %v2808_v7 = vunpack.i.l.bf16 %v2807_v4 }
 0x571   : > { %v2804_v11 = vunpack.i.h.bf16 %v2802_v5  ;;  %v2803_v12 = vunpack.i.l.bf16 %v2802_v5  ;;  %2875 = vpow2.f32 %v684_v3 }
 0x572   : > { %v2607_v15 = vpack.c.bf16 %v2809_v6, %v2808_v7 }
 0x573   : > { %v2603_v13 = vpack.c.bf16 %v2804_v11, %v2803_v12 }
 0x574   : > { %v786_v22 = vpop.permute.xlu1 %785 }
 0x575   : > { %2604 = vmatprep.subr.bf16.mxu0 %v2603_v13 }
 0x576   : > { %2606 = vmatpush3.bf16.msra.mxu0 %v2603_v13 }
 0x577   : > { %2609 = vmatprep.subr.msk.bf16.mxu0 %vm3425_vm2, %v2607_v15 }
 0x57a   : > { %v2874_v16 = vpop.eup %2873 }
 0x57b   : > { %v691_v18 = vsel %vm471_vm3, %v2874_v16, 0.0  ;;  %v2876_v19 = vpop.eup %2875 }
 0x57c   : > { %692 = vadd.xlane.f32.xlu1 %v691_v18  ;;  %v688_v21 = vsel %vm471_vm3, %v2876_v19, 0.0 }
 0x580   : > { %689 = vadd.xlane.f32.xlu1 %v688_v21 }
 0x591   : > { %787 = vrot.lane.b32.xlu1 %v3412_v8, %s3131_s28  ;;  %s3145_s28 = smov 100  }
 0x609   : > { %v693_v23 = vpop.xlane.xlu1 %692 }
 0x60a   : > { %2877 = vrcp.f32 %v693_v23 }
 0x60d   : > { %v690_v24 = vpop.xlane.xlu1 %689 }
 0x60e   : > { %2879 = vrcp.f32 %v690_v24 }
 0x611   : > { %v788_v29 = vpop.permute.xlu1 %787 }
 0x614   : > { %v2878_v25 = vpop.eup %2877 }
 0x615   : > { %v697_v28 = vmul.f32 %v2878_v25, %v2874_v16 }
 0x618   : > { %v2880_v26 = vpop.eup %2879 }
 0x619   : > { %v696_v27 = vmul.f32 %v2880_v26, %v2876_v19 }
 0x61b   : > { %2481 = vmatprep.mubr.msk.f32.mxu0 %vm471_vm3, %v696_v27 }
 0x61c   : > { %2482 = vmatmul.mubr.msk.f32.vlgmr.msra.gmra.mrb[2].mxu0 %vm471_vm3, %v697_v28 }
 0x61d   : > { %2612 = vmatpush3.bf16.xpose.msk.msra.mxu0 %vm3425_vm2, %v2607_v15  ;;  %2488 = vmatprep.mubr.msk.f32.mxu0 %vm383_vm1, %v786_v22 }
 0x624   : > { %2489 = vmatmul.mubr.msk.f32.vlgmr.msra.gmra.mrb[4].mxu0 %vm383_vm1, %v788_v29 }
 0x6ef   : > { %v3479_v30 = vpop.f32.mrb[2].mxu0 }
 0x6f0   : > { %v3481_v31 = vpop.f32.mrb[3].mxu0 }
 0x6f7   : > { %v2490_v32 = vpop.f32.mrb[4].mxu0 }
 0x6f8   : > { %v877_v33 = vmul.f32 0.5, %v2490_v32  ;;  %v867_v34 = vpop.f32.mrb[5].mxu0 }
 0x6f9   : > { %v876_v35 = vmul.f32 0.5, %v867_v34 }
 0x6fa   : > { %v879_v36 = vadd.f32 %v877_v33, %v3435_v17 }
 0x6fb   : > { %v878_v37 = vadd.f32 %v876_v35, %v3437_v20 }
 0x6fc   : > { %v883_v38 = vsel %vm471_vm3, %v879_v36, -inf }
 0x6fd   : > { %884 = vmax.xlane.f32.xlu0 %v883_v38  ;;  %v880_v39 = vsel %vm471_vm3, %v878_v37, -inf }
 0x6fe   : > { %881 = vmax.xlane.f32.xlu1 %v880_v39 }
 0x78a   : > { %v885_v40 = vpop.xlane.xlu0 %884 }
 0x78b   : > { %v887_v41 = vsub.f32 %v879_v36, %v885_v40  ;;  %v882_v42 = vpop.xlane.xlu1 %881 }
 0x78c   : > { %v886_v43 = vsub.f32 %v878_v37, %v882_v42 }
 0x78d   : > { %v890_v44 = vmul.f32 1.442695, %v887_v41 }
 0x78e   : > { %v888_v45 = vmul.f32 1.442695, %v886_v43 }
 0x78f   : > { %2881 = vpow2.f32 %v890_v44 }
 0x790   : > { %2883 = vpow2.f32 %v888_v45 }
 0x799   : > { %v2882_v46 = vpop.eup %2881 }
 0x79a   : > { %v2884_v47 = vpop.eup %2883  ;;  %v895_v48 = vsel %vm471_vm3, %v2882_v46, 0.0 }
 0x79b   : > { %896 = vadd.xlane.f32.xlu1 %v895_v48  ;;  %v892_v49 = vsel %vm471_vm3, %v2884_v47, 0.0 }
 0x79c   : > { %893 = vadd.xlane.f32.xlu0 %v892_v49 }
 0x7ac   : > { %2816 = vrot.lane.b32.xlu1 %v3420_v10, %s3132_s12  ;;  %s3146_s12 = smov 40  }
 0x7b0   : > { %989 = vrot.lane.b32.xlu1 %v3414_v9, %s3133_s9 }
 0x7b2   : > { %2811 = vrot.lane.b32.xlu0 %v3420_v10, %s3134_s15  ;;  %s3148_s15 = smov 36  }
 0x7b6   : > { %991 = vrot.lane.b32.xlu0 %v3412_v8, %s3133_s9  ;;  %s3147_s9 = smov 4  }
 0x828   : > { %v897_v50 = vpop.xlane.xlu1 %896 }
 0x829   : > { %2885 = vrcp.f32 %v897_v50  ;;  %v894_v51 = vpop.xlane.xlu0 %893 }
 0x82a   : > { %2887 = vrcp.f32 %v894_v51 }
 0x82c   : > { %v2817_v54 = vpop.permute.xlu1 %2816 }
 0x82d   : > { %v2812_v55 = vpop.permute.xlu0 %2811  ;;  %v2819_v56 = vunpack.i.h.bf16 %v2817_v54  ;;  %v2818_v57 = vunpack.i.l.bf16 %v2817_v54 }
 0x82e   : > { %v2814_v58 = vunpack.i.h.bf16 %v2812_v55  ;;  %v2813_v59 = vunpack.i.l.bf16 %v2812_v55 }
 0x82f   : > { %v2617_v61 = vpack.c.bf16 %v2819_v56, %v2818_v57 }
 0x830   : > { %v2613_v60 = vpack.c.bf16 %v2814_v58, %v2813_v59  ;;  %v990_v2 = vpop.permute.xlu1 %989 }
 0x831   : > { %v992_v3 = vpop.permute.xlu0 %991 }
 0x832   : > { %2614 = vmatprep.subr.bf16.mxu1 %v2613_v60 }
 0x833   : > { %v2886_v62 = vpop.eup %2885  ;;  %2616 = vmatpush3.bf16.msra.mxu1 %v2613_v60 }
 0x834   : > { %v2888_v63 = vpop.eup %2887  ;;  %2619 = vmatprep.subr.msk.bf16.mxu1 %vm3425_vm2, %v2617_v61  ;;  %v901_v1 = vmul.f32 %v2886_v62, %v2882_v46 }
 0x835   : > { %v900_v0 = vmul.f32 %v2888_v63, %v2884_v47 }
 0x837   : > { %2495 = vmatprep.mubr.msk.f32.mxu1 %vm471_vm3, %v900_v0 }
 0x838   : > { %2496 = vmatmul.mubr.msk.f32.vlgmr.msra.gmra.mrb[6].mxu1 %vm471_vm3, %v901_v1 }
 0x839   : > { %2502 = vmatprep.mubr.msk.f32.mxu1 %vm383_vm1, %v990_v2 }
 0x83c   : > { %2622 = vmatpush3.bf16.xpose.msk.msra.mxu1 %vm3425_vm2, %v2617_v61 }
 0x843   : > { %2503 = vmatmul.mubr.msk.f32.vlgmr.msra.gmra.mrb[8].mxu1 %vm383_vm1, %v992_v3 }
 0x90b   : > { %v3501_v4 = vpop.f32.mrb[6].mxu1 }
 0x90c   : > { %v3503_v5 = vpop.f32.mrb[7].mxu1 }
 0x916   : > { %v2504_v6 = vpop.f32.mrb[8].mxu1 }
 0x917   : > { %v1081_v7 = vmul.f32 0.5, %v2504_v6  ;;  %v1071_v11 = vpop.f32.mrb[9].mxu1 }
 0x918   : > { %v1080_v12 = vmul.f32 0.5, %v1071_v11 }
 0x919   : > { %v1083_v13 = vadd.f32 %v1081_v7, %v3435_v17 }
 0x91a   : > { %v1082_v15 = vadd.f32 %v1080_v12, %v3437_v20 }
 0x91b   : > { %v1087_v16 = vsel %vm471_vm3, %v1083_v13, -inf }
 0x91c   : > { %1088 = vmax.xlane.f32.xlu0 %v1087_v16  ;;  %v1084_v18 = vsel %vm471_vm3, %v1082_v15, -inf }
 0x91d   : > { %1085 = vmax.xlane.f32.xlu1 %v1084_v18 }
 0x9a9   : > { %v1089_v19 = vpop.xlane.xlu0 %1088 }
 0x9aa   : > { %v1091_v21 = vsub.f32 %v1083_v13, %v1089_v19  ;;  %v1086_v22 = vpop.xlane.xlu1 %1085 }
 0x9ab   : > { %v1090_v23 = vsub.f32 %v1082_v15, %v1086_v22 }
 0x9ac   : > { %v1094_v24 = vmul.f32 1.442695, %v1091_v21 }
 0x9ad   : > { %v1092_v25 = vmul.f32 1.442695, %v1090_v23 }
 0x9ae   : > { %2889 = vpow2.f32 %v1094_v24 }
 0x9af   : > { %2891 = vpow2.f32 %v1092_v25 }
 0x9b8   : > { %v2890_v26 = vpop.eup %2889 }
 0x9b9   : > { %v2892_v27 = vpop.eup %2891  ;;  %v1099_v28 = vsel %vm471_vm3, %v2890_v26, 0.0 }
 0x9ba   : > { %1100 = vadd.xlane.f32.xlu1 %v1099_v28  ;;  %v1096_v29 = vsel %vm471_vm3, %v2892_v27, 0.0 }
 0x9bb   : > { %1097 = vadd.xlane.f32.xlu0 %v1096_v29 }
 0x9cb   : > { %2826 = vrot.lane.b32.xlu1 %v3420_v10, %s3135_s17  ;;  %s3149_s17 = smov 8  }
 0x9cf   : > { %1193 = vrot.lane.b32.xlu1 %v3414_v9, %s3136_s10 }
 0x9d1   : > { %2821 = vrot.lane.b32.xlu0 %v3420_v10, %s3137_s11  ;;  %s3151_s11 = smov 16  }
 0x9d5   : > { %1195 = vrot.lane.b32.xlu0 %v3412_v8, %s3136_s10  ;;  %s3150_s10 = smov 12  }
 0xa47   : > { %v1101_v32 = vpop.xlane.xlu1 %1100 }
 0xa48   : > { %2893 = vrcp.f32 %v1101_v32  ;;  %v1098_v33 = vpop.xlane.xlu0 %1097 }
 0xa49   : > { %2895 = vrcp.f32 %v1098_v33 }
 0xa4b   : > { %v2827_v34 = vpop.permute.xlu1 %2826 }
 0xa4c   : > { %v2822_v35 = vpop.permute.xlu0 %2821  ;;  %v2829_v36 = vunpack.i.h.bf16 %v2827_v34  ;;  %v2828_v37 = vunpack.i.l.bf16 %v2827_v34 }
 0xa4d   : > { %v2824_v38 = vunpack.i.h.bf16 %v2822_v35  ;;  %v2823_v39 = vunpack.i.l.bf16 %v2822_v35 }
 0xa4e   : > { %v2627_v41 = vpack.c.bf16 %v2829_v36, %v2828_v37 }
 0xa4f   : > { %v2623_v40 = vpack.c.bf16 %v2824_v38, %v2823_v39  ;;  %v1194_v46 = vpop.permute.xlu1 %1193 }
 0xa50   : > { %v1196_v47 = vpop.permute.xlu0 %1195 }
 0xa51   : > { %2624 = vmatprep.subr.bf16.mxu0 %v2623_v40 }
 0xa52   : > { %v2894_v42 = vpop.eup %2893  ;;  %2626 = vmatpush3.bf16.msra.mxu0 %v2623_v40 }
 0xa53   : > { %v2896_v43 = vpop.eup %2895  ;;  %2629 = vmatprep.subr.msk.bf16.mxu0 %vm3425_vm2, %v2627_v41  ;;  %v1105_v45 = vmul.f32 %v2894_v42, %v2890_v26 }
 0xa54   : > { %v1104_v44 = vmul.f32 %v2896_v43, %v2892_v27 }
 0xa56   : > { %2509 = vmatprep.mubr.msk.f32.mxu0 %vm471_vm3, %v1104_v44 }
 0xa57   : > { %2510 = vmatmul.mubr.msk.f32.vlgmr.msra.gmra.mrb[6].mxu0 %vm471_vm3, %v1105_v45 }
 0xa58   : > { %2516 = vmatprep.mubr.msk.f32.mxu0 %vm383_vm1, %v1194_v46 }
 0xa5b   : > { %2632 = vmatpush3.bf16.xpose.msk.msra.mxu0 %vm3425_vm2, %v2627_v41 }
 0xa62   : > { %2517 = vmatmul.mubr.msk.f32.vlgmr.msra.gmra.mrb[8].mxu0 %vm383_vm1, %v1196_v47 }
 0xb2a   : > { %v3523_v48 = vpop.f32.mrb[6].mxu0 }
 0xb2b   : > { %v3525_v49 = vpop.f32.mrb[7].mxu0 }
 0xb35   : > { %v2518_v50 = vpop.f32.mrb[8].mxu0 }
 0xb36   : > { %v1285_v51 = vmul.f32 0.5, %v2518_v50  ;;  %v1275_v54 = vpop.f32.mrb[9].mxu0 }
 0xb37   : > { %v1284_v55 = vmul.f32 0.5, %v1275_v54 }
 0xb38   : > { %v1287_v56 = vadd.f32 %v1285_v51, %v3435_v17 }
 0xb39   : > { %v1286_v57 = vadd.f32 %v1284_v55, %v3437_v20 }
 0xb3a   : > { %v1291_v58 = vsel %vm471_vm3, %v1287_v56, -inf }
 0xb3b   : > { %1292 = vmax.xlane.f32.xlu0 %v1291_v58  ;;  %v1288_v59 = vsel %vm471_vm3, %v1286_v57, -inf }
 0xb3c   : > { %1289 = vmax.xlane.f32.xlu1 %v1288_v59 }
 0xbc8   : > { %v1293_v60 = vpop.xlane.xlu0 %1292 }
 0xbc9   : > { %v1295_v61 = vsub.f32 %v1287_v56, %v1293_v60  ;;  %v1290_v62 = vpop.xlane.xlu1 %1289 }
 0xbca   : > { %v1294_v63 = vsub.f32 %v1286_v57, %v1290_v62 }
 0xbcb   : > { %v1298_v0 = vmul.f32 1.442695, %v1295_v61 }
 0xbcc   : > { %v1296_v1 = vmul.f32 1.442695, %v1294_v63 }
 0xbcd   : > { %2897 = vpow2.f32 %v1298_v0 }
 0xbce   : > { %2899 = vpow2.f32 %v1296_v1 }
 0xbd7   : > { %v2898_v2 = vpop.eup %2897 }
 0xbd8   : > { %v2900_v3 = vpop.eup %2899  ;;  %v1303_v6 = vsel %vm471_vm3, %v2898_v2, 0.0 }
 0xbd9   : > { %1304 = vadd.xlane.f32.xlu1 %v1303_v6  ;;  %v1300_v7 = vsel %vm471_vm3, %v2900_v3, 0.0 }
 0xbda   : > { %1301 = vadd.xlane.f32.xlu0 %v1300_v7 }
 0xbea   : > { %2836 = vrot.lane.b32.xlu1 %v3420_v10, %s3138_s6  ;;  %s3152_s6 = smov 20  }
 0xbee   : > { %1397 = vrot.lane.b32.xlu1 %v3414_v9, %s3139_s24 }
 0xbf0   : > { %2831 = vrot.lane.b32.xlu0 %v3420_v10, %s3140_s26  ;;  %s3154_s26 = smov 28  }
 0xbf4   : > { %1399 = vrot.lane.b32.xlu0 %v3412_v8, %s3139_s24  ;;  %s3153_s24 = smov 24  }
 0xc66   : > { %v1305_v11 = vpop.xlane.xlu1 %1304 }
 0xc67   : > { %2901 = vrcp.f32 %v1305_v11  ;;  %v1302_v12 = vpop.xlane.xlu0 %1301 }
 0xc68   : > { %2903 = vrcp.f32 %v1302_v12 }
 0xc6a   : > { %v2837_v13 = vpop.permute.xlu1 %2836 }
 0xc6b   : > { %v2832_v15 = vpop.permute.xlu0 %2831  ;;  %v2839_v16 = vunpack.i.h.bf16 %v2837_v13  ;;  %v2838_v18 = vunpack.i.l.bf16 %v2837_v13 }
 0xc6c   : > { %v2834_v19 = vunpack.i.h.bf16 %v2832_v15  ;;  %v2833_v21 = vunpack.i.l.bf16 %v2832_v15 }
 0xc6d   : > { %v2637_v23 = vpack.c.bf16 %v2839_v16, %v2838_v18 }
 0xc6e   : > { %v2633_v22 = vpack.c.bf16 %v2834_v19, %v2833_v21  ;;  %v1398_v28 = vpop.permute.xlu1 %1397 }
 0xc6f   : > { %v1400_v29 = vpop.permute.xlu0 %1399 }
 0xc70   : > { %2634 = vmatprep.subr.bf16.mxu1 %v2633_v22 }
 0xc71   : > { %v2902_v24 = vpop.eup %2901  ;;  %2636 = vmatpush3.bf16.msra.mxu1 %v2633_v22 }
 0xc72   : > { %v2904_v25 = vpop.eup %2903  ;;  %2639 = vmatprep.subr.msk.bf16.mxu1 %vm3425_vm2, %v2637_v23  ;;  %v1309_v27 = vmul.f32 %v2902_v24, %v2898_v2 }
 0xc73   : > { %v1308_v26 = vmul.f32 %v2904_v25, %v2900_v3 }
 0xc75   : > { %2523 = vmatprep.mubr.msk.f32.mxu1 %vm471_vm3, %v1308_v26 }
 0xc76   : > { %2524 = vmatmul.mubr.msk.f32.vlgmr.msra.gmra.mrb[10].mxu1 %vm471_vm3, %v1309_v27 }
 0xc77   : > { %2530 = vmatprep.mubr.msk.f32.mxu1 %vm383_vm1, %v1398_v28 }
 0xc7a   : > { %2642 = vmatpush3.bf16.xpose.msk.msra.mxu1 %vm3425_vm2, %v2637_v23 }
 0xc81   : > { %2531 = vmatmul.mubr.msk.f32.vlgmr.msra.gmra.mrb[12].mxu1 %vm383_vm1, %v1400_v29 }
 0xd49   : > { %v3545_v32 = vpop.f32.mrb[10].mxu1 }
 0xd4a   : > { %v3547_v33 = vpop.f32.mrb[11].mxu1 }
 0xd54   : > { %v2532_v34 = vpop.f32.mrb[12].mxu1 }
 0xd55   : > { %v1489_v35 = vmul.f32 0.5, %v2532_v34  ;;  %v1479_v36 = vpop.f32.mrb[13].mxu1 }
 0xd56   : > { %v1488_v37 = vmul.f32 0.5, %v1479_v36 }
 0xd57   : > { %v1491_v38 = vadd.f32 %v1489_v35, %v3435_v17 }
 0xd58   : > { %v1490_v39 = vadd.f32 %v1488_v37, %v3437_v20 }
 0xd59   : > { %v1495_v40 = vsel %vm471_vm3, %v1491_v38, -inf }
 0xd5a   : > { %1496 = vmax.xlane.f32.xlu0 %v1495_v40  ;;  %v1492_v41 = vsel %vm471_vm3, %v1490_v39, -inf }
 0xd5b   : > { %1493 = vmax.xlane.f32.xlu1 %v1492_v41 }
 0xde7   : > { %v1497_v42 = vpop.xlane.xlu0 %1496 }
 0xde8   : > { %v1499_v43 = vsub.f32 %v1491_v38, %v1497_v42  ;;  %v1494_v44 = vpop.xlane.xlu1 %1493 }
 0xde9   : > { %v1498_v45 = vsub.f32 %v1490_v39, %v1494_v44 }
 0xdea   : > { %v1502_v46 = vmul.f32 1.442695, %v1499_v43 }
 0xdeb   : > { %v1500_v47 = vmul.f32 1.442695, %v1498_v45 }
 0xdec   : > { %2905 = vpow2.f32 %v1502_v46 }
 0xded   : > { %2907 = vpow2.f32 %v1500_v47 }
 0xdf6   : > { %v2906_v50 = vpop.eup %2905 }
 0xdf7   : > { %v2908_v51 = vpop.eup %2907  ;;  %v1507_v54 = vsel %vm471_vm3, %v2906_v50, 0.0 }
 0xdf8   : > { %1508 = vadd.xlane.f32.xlu1 %v1507_v54  ;;  %v1504_v55 = vsel %vm471_vm3, %v2908_v51, 0.0 }
 0xdf9   : > { %1505 = vadd.xlane.f32.xlu0 %v1504_v55 }
 0xe09   : > { %2846 = vrot.lane.b32.xlu1 %v3420_v10, %s3141_s23 }
 0xe0d   : > { %1601 = vrot.lane.b32.xlu1 %v3414_v9, %s3142_s27 }
 0xe0f   : > { %2841 = vrot.lane.b32.xlu0 %v3420_v10, %s3143_s13  ;;  %s286_s13 = scalar_lea.vmem [#allocation10], %s2304_s8  ;;  %s2179_s8 = scalar_lea.sflag [#allocation4], %s3392_s29 }
 0xe13   : > { %1603 = vrot.lane.b32.xlu0 %v3412_v8, %s3142_s27 }
 0xe85   : > { %v1509_v56 = vpop.xlane.xlu1 %1508 }
 0xe86   : > { %2909 = vrcp.f32 %v1509_v56  ;;  %v1506_v57 = vpop.xlane.xlu0 %1505 }
 0xe87   : > { %2911 = vrcp.f32 %v1506_v57 }
 0xe89   : > { %v2847_v58 = vpop.permute.xlu1 %2846 }
 0xe8a   : > { %v2842_v59 = vpop.permute.xlu0 %2841  ;;  %v2849_v60 = vunpack.i.h.bf16 %v2847_v58  ;;  %v2848_v61 = vunpack.i.l.bf16 %v2847_v58 }
 0xe8b   : > { %v2844_v62 = vunpack.i.h.bf16 %v2842_v59  ;;  %v2843_v63 = vunpack.i.l.bf16 %v2842_v59 }
 0xe8c   : > { %v2647_v1 = vpack.c.bf16 %v2849_v60, %v2848_v61 }
 0xe8d   : > { %v2643_v0 = vpack.c.bf16 %v2844_v62, %v2843_v63  ;;  %v1602_v11 = vpop.permute.xlu1 %1601 }
 0xe8e   : > { %v1604_v12 = vpop.permute.xlu0 %1603 }
 0xe8f   : > { %2644 = vmatprep.subr.bf16.mxu0 %v2643_v0 }
 0xe90   : > { %v2910_v2 = vpop.eup %2909  ;;  %2646 = vmatpush3.bf16.msra.mxu0 %v2643_v0 }
 0xe91   : > { %v2912_v3 = vpop.eup %2911  ;;  %2649 = vmatprep.subr.msk.bf16.mxu0 %vm3425_vm2, %v2647_v1  ;;  %v1513_v7 = vmul.f32 %v2910_v2, %v2906_v50 }
 0xe92   : > { %v1512_v6 = vmul.f32 %v2912_v3, %v2908_v51 }
 0xe94   : > { %2537 = vmatprep.mubr.msk.f32.mxu0 %vm471_vm3, %v1512_v6 }
 0xe95   : > { %2538 = vmatmul.mubr.msk.f32.vlgmr.msra.gmra.mrb[10].mxu0 %vm471_vm3, %v1513_v7 }
 0xe96   : > { %2544 = vmatprep.mubr.msk.f32.mxu0 %vm383_vm1, %v1602_v11 }
 0xe99   : > { %2652 = vmatpush3.bf16.xpose.msk.msra.mxu0 %vm3425_vm2, %v2647_v1 }
 0xea0   : > { %2545 = vmatmul.mubr.msk.f32.vlgmr.msra.gmra.mrb[12].mxu0 %vm383_vm1, %v1604_v12 }
 0xf68   : > { %v3567_v13 = vpop.f32.mrb[10].mxu0 }
 0xf69   : > { %v3569_v15 = vpop.f32.mrb[11].mxu0 }
 0xf73   : > { %v2546_v16 = vpop.f32.mrb[12].mxu0 }
 0xf74   : > { %v1693_v18 = vmul.f32 0.5, %v2546_v16  ;;  %v1683_v19 = vpop.f32.mrb[13].mxu0 }
 0xf75   : > { %v1692_v21 = vmul.f32 0.5, %v1683_v19 }
 0xf76   : > { %v1695_v22 = vadd.f32 %v1693_v18, %v3435_v17 }
 0xf77   : > { %v1694_v23 = vadd.f32 %v1692_v21, %v3437_v20 }
 0xf78   : > { %v1699_v24 = vsel %vm471_vm3, %v1695_v22, -inf }
 0xf79   : > { %1700 = vmax.xlane.f32.xlu0 %v1699_v24  ;;  %v1696_v25 = vsel %vm471_vm3, %v1694_v23, -inf  ;;  %v2087_v24 = vld [vmem:[#allocation7 + $0x18] sm:$0xff] }
 0xf7a   : > { %1697 = vmax.xlane.f32.xlu1 %v1696_v25 }
0x1006   : > { %v1701_v26 = vpop.xlane.xlu0 %1700 }
0x1007   : > { %v1703_v27 = vsub.f32 %v1695_v22, %v1701_v26  ;;  %v1698_v28 = vpop.xlane.xlu1 %1697  ;;  %v2086_v22 = vld [vmem:[#allocation7 + $0x10] sm:$0xff] }
0x1008   : > { %v1702_v29 = vsub.f32 %v1694_v23, %v1698_v28  ;;  %v2671_v25 = vpack.c.bf16 %v2087_v24, %v2086_v22 }
0x1009   : > { %v1706_v34 = vmul.f32 1.442695, %v1703_v27 }
0x100a   : > { %v1704_v35 = vmul.f32 1.442695, %v1702_v29 }
0x100b   : > { %2913 = vpow2.f32 %v1706_v34 }
0x100c   : > { %2915 = vpow2.f32 %v1704_v35 }
0x1015   : > { %v2914_v36 = vpop.eup %2913 }
0x1016   : > { %v2916_v37 = vpop.eup %2915  ;;  %v1711_v38 = vsel %vm471_vm3, %v2914_v36, 0.0 }
0x1017   : > { %1712 = vadd.xlane.f32.xlu1 %v1711_v38  ;;  %v1708_v39 = vsel %vm471_vm3, %v2916_v37, 0.0 }
0x1018   : > { %1709 = vadd.xlane.f32.xlu0 %v1708_v39 }
0x1028   : > { %2856 = vrot.lane.b32.xlu1 %v3420_v10, %s3144_s16  ;;  %s2192_s16 = sshll.u32 %s286_s13, 4  ;;  %s3624_s16 = int_to_ptr.vmem [resolvable:$true] %s2192_s16 }
0x102c   : > { %1805 = vrot.lane.b32.xlu1 %v3414_v9, %s3145_s28 }
0x102e   : > { %2851 = vrot.lane.b32.xlu0 %v3420_v10, %s3146_s12 }
0x1032   : > { %1807 = vrot.lane.b32.xlu0 %v3412_v8, %s3145_s28  ;;  %s2368_s28 = sshll.u32 %s3208_s22, 8  ;;  %s3043_s22 = scalar_lea.vmem %s3624_s16, 256 }
0x1033   : > { %p3044_p10 = scmp.ne.s32.totalorder %s3624_s16, %s3043_s22 }
0x1035   : > { %p3045_p3 = pnand %p3044_p10, %p3341_p5 }
0x1037   : > { %p3046_p7 = pneg %p3045_p3 }
0x10a4   : > { %v1713_v40 = vpop.xlane.xlu1 %1712 }
0x10a5   : > { %2917 = vrcp.f32 %v1713_v40  ;;  %v1710_v41 = vpop.xlane.xlu0 %1709 }
0x10a6   : > { %2919 = vrcp.f32 %v1710_v41 }
0x10a8   : > { %v2857_v42 = vpop.permute.xlu1 %2856 }
0x10a9   : > { %v2852_v43 = vpop.permute.xlu0 %2851  ;;  %v2859_v44 = vunpack.i.h.bf16 %v2857_v42  ;;  %v2858_v45 = vunpack.i.l.bf16 %v2857_v42 }
0x10aa   : > { %v2854_v46 = vunpack.i.h.bf16 %v2852_v43  ;;  %v2853_v47 = vunpack.i.l.bf16 %v2852_v43 }
0x10ab   : > { %v2657_v51 = vpack.c.bf16 %v2859_v44, %v2858_v45 }
0x10ac   : > { %v2653_v50 = vpack.c.bf16 %v2854_v46, %v2853_v47  ;;  %v1806_v56 = vpop.permute.xlu1 %1805 }
0x10ad   : > { %v1808_v57 = vpop.permute.xlu0 %1807 }
0x10ae   : > { %2654 = vmatprep.subr.bf16.mxu1 %v2653_v50 }
0x10af   : > { %v2918_v54 = vpop.eup %2917  ;;  %2656 = vmatpush3.bf16.msra.mxu1 %v2653_v50 }
0x10b0   : > { %v2920_v9 = vpop.eup %2919  ;;  %2659 = vmatprep.subr.msk.bf16.mxu1 %vm3425_vm2, %v2657_v51  ;;  %v1717_v55 = vmul.f32 %v2918_v54, %v2914_v36 }
0x10b1   : > { %v1716_v8 = vmul.f32 %v2920_v9, %v2916_v37 }
0x10b3   : > { %2551 = vmatprep.mubr.msk.f32.mxu1 %vm471_vm3, %v1716_v8 }
0x10b4   : > { %2552 = vmatmul.mubr.msk.f32.vlgmr.msra.gmra.mrb[14].mxu1 %vm471_vm3, %v1717_v55 }
0x10b5   : > { %2558 = vmatprep.mubr.msk.f32.mxu1 %vm383_vm1, %v1806_v56 }
0x10b8   : > { %2662 = vmatpush3.bf16.xpose.msk.msra.mxu1 %vm3425_vm2, %v2657_v51 }
0x10bf   : > { %2559 = vmatmul.mubr.msk.f32.vlgmr.msra.gmra.mrb[16].mxu1 %vm383_vm1, %v1808_v57 }
0x1187   : > { %v2553_v58 = vpop.f32.mrb[14].mxu1 }
0x1188   : > { %v1796_v59 = vpop.f32.mrb[15].mxu1 }
0x1192   : > { %v2560_v60 = vpop.f32.mrb[16].mxu1 }
0x1193   : > { %v1897_v61 = vmul.f32 0.5, %v2560_v60  ;;  %v1887_v62 = vpop.f32.mrb[17].mxu1  ;;  %v2359_v60 = vld [vmem:[%s3679_s3] ss:$0 sm:$0xff] }
0x1194   : > { %v1896_v63 = vmul.f32 0.5, %v1887_v62 }
0x1195   : > { %v1899_v0 = vadd.f32 %v1897_v61, %v3435_v17 }
0x1196   : > { %v1898_v1 = vadd.f32 %v1896_v63, %v3437_v20 }
0x1197   : > { %v1903_v2 = vsel %vm471_vm3, %v1899_v0, -inf }
0x1198   : > { %1904 = vmax.xlane.f32.xlu0 %v1903_v2  ;;  %v1900_v3 = vsel %vm471_vm3, %v1898_v1, -inf }
0x1199   : > { %1901 = vmax.xlane.f32.xlu1 %v1900_v3 }
0x1225   : > { %v1905_v14 = vpop.xlane.xlu0 %1904 }
0x1226   : > { %v1907_v6 = vsub.f32 %v1899_v0, %v1905_v14  ;;  %v1902_v7 = vpop.xlane.xlu1 %1901 }
0x1227   : > { %v1906_v11 = vsub.f32 %v1898_v1, %v1902_v7 }
0x1228   : > { %v1910_v12 = vmul.f32 1.442695, %v1907_v6 }
0x1229   : > { %v1908_v16 = vmul.f32 1.442695, %v1906_v11 }
0x122a   : > { %2921 = vpow2.f32 %v1910_v12 }
0x122b   : > { %2923 = vpow2.f32 %v1908_v16 }
0x1234   : > { %v2922_v18 = vpop.eup %2921 }
0x1235   : > { %v2924_v19 = vpop.eup %2923  ;;  %v1915_v17 = vsel %vm471_vm3, %v2922_v18, 0.0 }
0x1236   : > { %1916 = vadd.xlane.f32.xlu1 %v1915_v17  ;;  %v1912_v20 = vsel %vm471_vm3, %v2924_v19, 0.0 }
0x1237   : > { %1913 = vadd.xlane.f32.xlu0 %v1912_v20 }
0x1247   : > { %2011 = vrot.lane.b32.xlu1 %v3481_v31, %s3147_s9 }
0x124b   : > { %2013 = vrot.lane.b32.xlu1 %v3479_v30, %s3147_s9 }
0x124d   : > { %2861 = vrot.lane.b32.xlu0 %v3420_v10, %s3148_s15  ;;  %s3629_s15 = scalar_lea.hbm %s3681_s5, %s2368_s28 }
0x124f   : > { %2021 = vrot.lane.b32.xlu1 %v3501_v4, %s3149_s17 }
0x1251   : > { %2019 = vrot.lane.b32.xlu0 %v3503_v5, %s3149_s17 }
0x1253   : > { %2029 = vrot.lane.b32.xlu1 %v3523_v48, %s3150_s10 }
0x1255   : > { %2027 = vrot.lane.b32.xlu0 %v3525_v49, %s3150_s10  ;;  %s3155_s10 = smov [#allocation10]  }
0x1257   : > { %2037 = vrot.lane.b32.xlu1 %v3545_v32, %s3151_s11 }
0x1259   : > { %2035 = vrot.lane.b32.xlu0 %v3547_v33, %s3151_s11  ;;  %s3047_s11 = sshll.u32 %s3155_s10, 4  ;;  %s3048_s11 = int_to_ptr.vmem [resolvable:$false] %s3047_s11 }
0x125a   : > { %p3050_p12 = scmp.lt.s32.totalorder %s3624_s16, %s3048_s11 }
0x125b   : > { %2045 = vrot.lane.b32.xlu1 %v3567_v13, %s3152_s6  ;;  %v2084_v13 = vld [vmem:[#allocation7] sm:$0xff] }
0x125d   : > { %2043 = vrot.lane.b32.xlu0 %v3569_v15, %s3152_s6  ;;  %v2085_v15 = vld [vmem:[#allocation7 + $0x8] sm:$0xff]  ;;  %s3049_s6 = scalar_lea.vmem %s3048_s11, 512 }
0x125e   : > { %v2667_v23 = vpack.c.bf16 %v2085_v15, %v2084_v13  ;;  %p3051_p1 = scmp.lt.s32.totalorder %s3049_s6, %s3043_s22 }
0x125f   : > { %2053 = vrot.lane.b32.xlu1 %v2553_v58, %s3153_s24 }
0x1260   : > { %p3052_p2 = por %p3051_p1, %p3050_p12 }
0x1261   : > { %2051 = vrot.lane.b32.xlu0 %v1796_v59, %s3153_s24 }
0x1262   : > { %p3053_p4 = pnand %p3052_p2, %p3046_p7 }
0x12c3   : > { %v1917_v10 = vpop.xlane.xlu1 %1916 }
0x12c4   : > { %2925 = vrcp.f32 %v1917_v10  ;;  %v1914_v30 = vpop.xlane.xlu0 %1913 }
0x12c5   : > { %2927 = vrcp.f32 %v1914_v30 }
0x12c7   : > { %v2012_v28 = vpop.permute.xlu1 %2011 }
0x12c8   : > { %v2862_v31 = vpop.permute.xlu0 %2861  ;;  %v2065_v42 = vsel %vm383_vm1, %v3459_v53, %v2012_v28 }
0x12c9   : > { %v2864_v4 = vunpack.i.h.bf16 %v2862_v31  ;;  %v2863_v5 = vunpack.i.l.bf16 %v2862_v31 }
0x12cb   : > { %v2663_v48 = vpack.c.bf16 %v2864_v4, %v2863_v5  ;;  %v2014_v29 = vpop.permute.xlu1 %2013 }
0x12cc   : > { %v2020_v35 = vpop.permute.xlu0 %2019  ;;  %v2066_v44 = vsel %vm383_vm1, %v3457_v52, %v2014_v29 }
0x12cd   : > { %2664 = vmatprep.subr.bf16.mxu0 %v2663_v48  ;;  %v2068_v45 = vsel %vm2067_vm4, %v2065_v42, %v2020_v35 }
0x12ce   : > { %v2926_v49 = vpop.eup %2925  ;;  %2666 = vmatpush3.bf16.msra.mxu0 %v2663_v48 }
0x12cf   : > { %v2928_v32 = vpop.eup %2927  ;;  %v1921_v21 = vmul.f32 %v2926_v49, %v2922_v18  ;;  %2668 = vmatprep.subr.bf16.mxu0 %v2667_v23  ;;  %v2022_v34 = vpop.permute.xlu1 %2021 }
0x12d0   : > { %v1920_v33 = vmul.f32 %v2928_v32, %v2924_v19  ;;  %v2028_v37 = vpop.permute.xlu0 %2027  ;;  %v2069_v47 = vsel %vm2067_vm4, %v2066_v44, %v2022_v34 }
0x12d1   : > { %v2071_v50 = vsel %vm2070_vm5, %v2068_v45, %v2028_v37 }
0x12d2   : > { %2565 = vmatprep.mubr.msk.f32.mxu0 %vm471_vm3, %v1920_v33 }
0x12d3   : > { %2566 = vmatmul.mubr.msk.f32.vlgmr.msra.gmra.mrb[14].mxu0 %vm471_vm3, %v1921_v21  ;;  %v2030_v36 = vpop.permute.xlu1 %2029 }
0x12d4   : > { %2670 = vmatpush3.bf16.msra.mxu0 %v2667_v23  ;;  %v2036_v39 = vpop.permute.xlu0 %2035  ;;  %v2072_v51 = vsel %vm2070_vm5, %v2069_v47, %v2030_v36 }
0x12d5   : > { %2672 = vmatprep.subr.bf16.mxu0 %v2671_v25  ;;  %v2073_v54 = vsel %vm471_vm3, %v2071_v50, %v2036_v39 }
0x12d7   : > { %v2038_v38 = vpop.permute.xlu1 %2037 }
0x12d8   : > { %2674 = vmatpush3.bf16.msra.mxu0 %v2671_v25  ;;  %v2044_v41 = vpop.permute.xlu0 %2043  ;;  %v2074_v9 = vsel %vm471_vm3, %v2072_v51, %v2038_v38 }
0x12d9   : > { %v2076_v8 = vsel %vm2075_vm6, %v2073_v54, %v2044_v41 }
0x12db   : > { %v2046_v40 = vpop.permute.xlu1 %2045 }
0x12dc   : > { %v2052_v46 = vpop.permute.xlu0 %2051  ;;  %v2077_v55 = vsel %vm2075_vm6, %v2074_v9, %v2046_v40 }
0x12dd   : > { %v2079_v56 = vsel %vm2078_vm7, %v2076_v8, %v2052_v46 }
0x12df   : > { %v2054_v43 = vpop.permute.xlu1 %2053 }
0x12e0   : > { %v2080_v52 = vsel %vm2078_vm7, %v2077_v55, %v2054_v43 }
0x13a6   : > { %v2567_v26 = vpop.f32.mrb[14].mxu0 }
0x13a7   : > { %2061 = vrot.lane.b32.xlu1 %v2567_v26, %s3154_s26  ;;  %v2000_v27 = vpop.f32.mrb[15].mxu0 }
0x13a8   : > { %2059 = vrot.lane.b32.xlu0 %v2000_v27, %s3154_s26 }
0x1419   : > { %v2062_v53 = vpop.permute.xlu1 %2061 }
0x141a   : > { %v2060_v57 = vpop.permute.xlu0 %2059  ;;  %v2083_v59 = vsel %vm2081_vm8, %v2080_v52, %v2062_v53 }
0x141b   : > { %v2082_v58 = vsel %vm2081_vm8, %v2079_v56, %v2060_v57 }
0x141c   : > { %2576 = vmatprep.mubr.msk.f32.mxu0 %vm293_vm0, %v2082_v58 }
0x141d   : > { %2577 = vmatmul.mubr.msk.f32.vlgmr.msra.gmra.mrb[16].mxu0 %vm293_vm0, %v2083_v59 }
0x14f0   : > { %v2578_v61 = vpop.f32.mrb[16].mxu0 }
0x14f1   : > { %v2173_v62 = vadd.f32 %v2578_v61, %v2359_v60  ;;  %v2167_v63 = vpop.f32.mrb[17].mxu0 }
0x14f2   : > { %v2168_v0 = vadd.f32 %v2359_v60, %v2167_v63 }
0x14f3   : > { %2177 = vst.msk [vmem:[%s286_s13 + $0x8] sm:$0xff] %vm293_vm0, %v2173_v62 }
0x14f4   : > { %2176 = vst.msk [vmem:[%s286_s13] sm:$0xff] %vm293_vm0, %v2168_v0 }
0x14f5   : > { %3056 = shalt.err (!%p3053_p4)
}
0x14f6   : > { %s3057_s24 = scalar_lea.hbm %s3629_s15, 256  ;;  %s3061_s27 = scalar_lea.hbm %s3681_s5, 512 }
0x14f7   : > { %p3058_p9 = scmp.ne.s32.totalorder %s3629_s15, %s3057_s24  ;;  %p3062_p8 = scmp.lt.u32.totalorder %s3629_s15, %s3681_s5 }
0x14f8   : > { %p3063_p13 = scmp.lt.u32.totalorder %s3061_s27, %s3057_s24  ;;  %p3065_p10 = scmp.lt.u32.totalorder %s3057_s24, %s3629_s15 }
0x14f9   : > { %p3059_p0 = pnand %p3058_p9, %p3341_p5 }
0x14fa   : > { %p3064_p6 = por %p3063_p13, %p3062_p8 }
0x14fb   : > { %p3060_p11 = pneg %p3059_p0 }
0x14fc   : > { %p3066_p3 = por %p3065_p10, %p3064_p6 }
0x14fe   : > { %p3067_p7 = pnand %p3066_p3, %p3060_p11 }
0x1500   : > { %3070 = shalt.err (!%p3067_p7)
}
0x1501   : > { %s3156_s12 = smov 128  }
0x1502   : > { %2689 = dma.vmem_to_hbm [thread:$0]  (%p3341_p5), %s3624_s16, 256, %s3629_s15, %s2179_s8, %s3156_s12, %s3156_s12, %s3149_s17  }
0x1503 PF: > { %s2207_s9 = sand.u32 1, %s3105_s18   ;;  %p3701_p12 = scmp.ne.s32.totalorder %s3686_s25, 0 }
0x1504   : > { %p3702_p1 = scmp.ge.s32.totalorder %s3117_s21, 2  ;;  %s2208_s22 = scalar_lea.sflag [#allocation4], %s2207_s9 }
0x1506   : > { %p2706_p2 = pnand %p3702_p1, %p3701_p12 }
0x1508   : > { %3100 = dma.done.wait (!%p2706_p2), %s2208_s22, 256  }
0x1509   : > { %3102 = vsyncadd (!%p2706_p2), %s2208_s22, 4294967040  ;;  %p20_p4 = scmp.ge.s32.totalorder %s3327_s14, 4   ;;  %s3703_s18 = smov %s3109_s19 }
0x150a   : > { %s3704_s19 = smov %s3113_s20  ;;  %s3705_s20 = smov %s3337_s30 }
0x150b   : > { %s3706_s21 = smov %s3327_s14  ;;  %22 = sbr.rel (!%p20_p4) target bundleno = 7 (0x7), region = 97 }
0x1512   :  { %2213 = vsyncpa [#allocation3], 1 }
0x1513   :  { %2215 = vsyncpa [#allocation3 + $0x1], 1 }
0x1514   :  { %2216 = vsyncpa [#allocation6], 1 }
0x1515   :  { %2217 = vsyncpa [#allocation9], 1 }
0x1516   :  { %2218 = vsyncpa [#allocation4], 1 }
0x1517   :  { %2220 = vsyncpa [#allocation4 + $0x1], 1 }

</bundles_post_ra>
